<compile_context>
chip_gen: v6e
topology: v6e:2x2x1
jax: 0.10.0
libtpu: 0.0.40
codegen_flags: <defaults>
</compile_context>

<pallas_src>
import functools

import jax
import jax.numpy as jnp
from jax import lax
from jax.experimental import pallas as pl
from jax.experimental.pallas import tpu as pltpu

EPS = 1e-5           # BatchNorm eps
C_OUT = 16           # nn.Conv2d(1, batch_size=16, ...)
NUM_CLASSES = 27
H_IN = 32            # fc expects 16*15*15 -> input spatial must be 32x32
H_CONV = 30          # 32 - 3 + 1
H_POOL = 15          # 30 // 2
FC_H = 128           # hidden width of self.fc
K_PAD = 128          # im2col K (3*32 = 96) padded to one full MXU pass
W_COLS = 512         # conv columns: (w%2)*256 + (w//2)*16 + c  (240 used per half)


# ---------------------------------------------------------------------------
# Fused kernel for one batch block of `bb` images.
# ---------------------------------------------------------------------------
def _fused_kernel(xe_ref, xo_ref, a_ref, shift_ref, w1_ref, b1_ref, w2_ref,
                  b2_ref, o_ref, *, bb):
    a = a_ref[...]                                  # (128, 512) bf16
    shift = shift_ref[...]                          # (1, 512)   f32
    # Conv2d(1->16, 3x3, valid) with BN scale folded in: two bf16 MXU matmuls.
    #   ze row p*bb + b = conv row 2p   of image b
    #   zo row p*bb + b = conv row 2p+1 of image b
    ze = jnp.dot(xe_ref[...], a, preferred_element_type=jnp.float32)  # (bb*16, 512)
    zo = jnp.dot(xo_ref[...], a, preferred_element_type=jnp.float32)  # (bb*16, 512)
    # BN shift (conv bias folded in) + ReLU in f32 (v5e VPU has no bf16 path).
    ye = jnp.maximum(ze + shift, 0.0)
    yo = jnp.maximum(zo + shift, 0.0)
    # 2x2/2 MaxPool with zero sublane shuffles:
    #   W-pool: the two aligned 256-lane halves (even w / odd w columns)
    #   H-pool: the even-row vs odd-row matmul results.
    pooled = jnp.maximum(jnp.maximum(ye[:, :256], ye[:, 256:]),
                         jnp.maximum(yo[:, :256], yo[:, 256:]))        # (bb*16, 256)
    pooled = pooled.astype(jnp.bfloat16)
    # fc (3600 -> 128): 15-step accumulated contraction.  Each LHS slice is a
    # contiguous, vreg-aligned block of bb rows (bb % 8 == 0); pooled row p=15
    # (partial conv rows 30/31) is never touched.
    acc = jnp.zeros((bb, FC_H), jnp.float32)
    for p in range(H_POOL):
        acc = acc + jnp.dot(pooled[p * bb:(p + 1) * bb, :], w1_ref[p],
                            preferred_element_type=jnp.float32)
    h1 = jnp.maximum(acc + b1_ref[...], 0.0)
    # fc1 (128 -> 27, padded to 128 output lanes for an unmasked store).
    out = jnp.dot(h1.astype(jnp.bfloat16), w2_ref[...],
                  preferred_element_type=jnp.float32) + b2_ref[...]
    o_ref[...] = out                                                   # (bb, 128)


# ---------------------------------------------------------------------------
# One-time weight preparation (pure JAX; all reordering folded in here).
# ---------------------------------------------------------------------------
def prepare_dannet1_params(params):
    conv_w, conv_b, gamma, beta, mean, var, fc_w, fc_b, fc1_w, fc1_b = params

    scale = gamma / jnp.sqrt(var + EPS)                 # (16,) BN scale
    shift = beta + (conv_b - mean) * scale              # (16,) BN shift + folded conv bias

    # Conv taps * BN scale, indexed [di, dj, c].
    k = jnp.transpose(conv_w[:, 0], (1, 2, 0)) * scale[None, None, :]   # (3, 3, 16)

    # A[di*32 + j, (w%2)*256 + (w//2)*16 + c] = k[di, j - w, c] for 0 <= j-w <= 2.
    j = jnp.arange(H_IN)
    w = jnp.arange(H_CONV)
    dj = j[:, None] - w[None, :]                                        # (32, 30)
    valid = (dj >= 0) & (dj <= 2)
    a4 = k[:, jnp.clip(dj, 0, 2), :]                                    # (3, 32, 30, 16)
    a4 = jnp.where(valid[None, :, :, None], a4, 0.0)
    a5 = a4.reshape(3, H_IN, H_POOL, 2, C_OUT)                          # w -> (w//2, w%2)
    a5 = jnp.transpose(a5, (0, 1, 3, 2, 4)).reshape(3, H_IN, 2, H_POOL * C_OUT)
    a5 = jnp.pad(a5, ((0, 0), (0, 0), (0, 0), (0, 16)))                 # pad 240 -> 256
    a_mat = a5.reshape(3 * H_IN, W_COLS)                                # (96, 512)
    a_mat = jnp.pad(a_mat, ((0, K_PAD - 3 * H_IN), (0, 0))).astype(jnp.bfloat16)  # (128, 512)

    # BN shift laid out in the same permuted column order (zeros in pad columns).
    shift_half = jnp.pad(jnp.tile(shift[None, :], (H_POOL, 1)).reshape(H_POOL * C_OUT),
                         (0, 16))                                       # (256,)
    shift_row = jnp.concatenate([shift_half, shift_half])[None, :].astype(jnp.float32)

    # fc weight: torch CHW flatten index c*225 + p*15 + q  ->  kernel layout
    # [p, q*16 + c, n], lane-padded 240 -> 256 per pooled row.
    w1 = jnp.transpose(fc_w.reshape(FC_H, C_OUT, H_POOL, H_POOL), (2, 3, 1, 0))  # [p,q,c,n]
    w1 = w1.reshape(H_POOL, H_POOL * C_OUT, FC_H)                        # (15, 240, 128)
    w1 = jnp.pad(w1, ((0, 0), (0, 16), (0, 0))).astype(jnp.bfloat16)     # (15, 256, 128)
    b1 = fc_b.reshape(1, FC_H).astype(jnp.float32)

    # Final Linear padded to 128 output lanes (unmasked store; sliced in wrapper).
    w2 = jnp.pad(fc1_w.T, ((0, 0), (0, 128 - NUM_CLASSES))).astype(jnp.bfloat16)  # (128, 128)
    b2 = jnp.pad(fc1_b, (0, 128 - NUM_CLASSES)).reshape(1, 128).astype(jnp.float32)

    return a_mat, shift_row, w1, b1, w2, b2


def _pick_bb(batch):
    """Batch-block size: big blocks for MXU/step-overhead, >=2 steps when possible."""
    if batch >= 64:
        return 32                                  # many parallel steps, ~3 MB VMEM live
    # small / medium batches: ~half the batch rounded up to a multiple of 8 so
    # v7x's two TensorCores still get (up to) two parallel grid steps.
    return max(8, ((batch + 15) // 16) * 8)


# ---------------------------------------------------------------------------
# Forward pass: bf16 im2col prep in JAX, everything else inside one kernel.
# ---------------------------------------------------------------------------
@jax.jit
def dannet1_forward(x_nchw, prepped):
    a_mat, shift_row, w1, b1, w2, b2 = prepped
    B = x_nchw.shape[0]
    bb = _pick_bb(B)
    n_blk = -(-B // bb)
    B_pad = n_blk * bb

    # Zero-pad the batch to a multiple of bb and add 2 zero rows below each
    # image so the bottom im2col rows stay in-bounds (they feed only the unused
    # pooled row p=15).
    ximg = x_nchw[:, 0].astype(jnp.bfloat16)                           # (B, 32, 32)
    xpad = jnp.pad(ximg, ((0, B_pad - B), (0, 2), (0, 0)))             # (B_pad, 34, 32)

    def im2col(off):
        # row p*bb + b  <-  input rows (2p+off, 2p+1+off, 2p+2+off) of image b.
        r = jnp.stack([xpad[:, off + d:off + d + H_IN:2, :] for d in range(3)],
                      axis=2)                                          # (B_pad, 16, 3, 32)
        r = r.reshape(n_blk, bb, 16, 3 * H_IN)
        r = jnp.transpose(r, (0, 2, 1, 3)).reshape(B_pad * 16, 3 * H_IN)
        return jnp.pad(r, ((0, 0), (0, K_PAD - 3 * H_IN)))             # bf16 (B_pad*16, 128)

    xim_e = im2col(0)    # even conv rows
    xim_o = im2col(1)    # odd conv rows

    # TODO(synk): nn.Dropout is identity in eval mode; training-mode masking not implemented.
    # TODO(synk): could stream the raw 2 KB/image input and build the im2col in-kernel
    #             (3 accumulated K=32 matmuls) to cut input DMA another 4x if ever HBM-bound.

    kernel = functools.partial(_fused_kernel, bb=bb)
    out = pl.pallas_call(
        kernel,
        out_shape=jax.ShapeDtypeStruct((B_pad, 128), jnp.float32),
        grid=(n_blk,),
        in_specs=[
            pl.BlockSpec((bb * 16, K_PAD), lambda i: (i, 0)),       # im2col, even conv rows
            pl.BlockSpec((bb * 16, K_PAD), lambda i: (i, 0)),       # im2col, odd conv rows
            pl.BlockSpec((K_PAD, W_COLS), lambda i: (0, 0)),        # conv + BN-scale matrix
            pl.BlockSpec((1, W_COLS), lambda i: (0, 0)),            # BN shift row
            pl.BlockSpec((H_POOL, 256, FC_H), lambda i: (0, 0, 0)),  # fc weight (15,256,128)
            pl.BlockSpec((1, FC_H), lambda i: (0, 0)),              # fc bias
            pl.BlockSpec((FC_H, 128), lambda i: (0, 0)),            # fc1 weight (padded)
            pl.BlockSpec((1, 128), lambda i: (0, 0)),               # fc1 bias (padded)
        ],
        out_specs=pl.BlockSpec((bb, 128), lambda i: (i, 0)),
        compiler_params=pltpu.CompilerParams(dimension_semantics=("parallel",)),
    )(xim_e, xim_o, a_mat, shift_row, w1, b1, w2, b2)

    return out[:B, :NUM_CLASSES]


# ---------------------------------------------------------------------------
# Pure-JAX reference (mirrors the PyTorch forward exactly, eval mode).
# ---------------------------------------------------------------------------
def reference_forward(x_nchw, params):
    conv_w, conv_b, gamma, beta, mean, var, fc_w, fc_b, fc1_w, fc1_b = params
    y = lax.conv_general_dilated(x_nchw, conv_w, (1, 1), 'VALID',
                                 dimension_numbers=('NCHW', 'OIHW', 'NCHW'))
    y = y + conv_b[None, :, None, None]
    y = (y - mean[None, :, None, None]) / jnp.sqrt(var + EPS)[None, :, None, None]
    y = y * gamma[None, :, None, None] + beta[None, :, None, None]
    y = jnp.maximum(y, 0.0)
    p = lax.reduce_window(y, -jnp.inf, lax.max, (1, 1, 2, 2), (1, 1, 2, 2), 'VALID')
    flat = p.reshape(p.shape[0], -1)
    h = jnp.maximum(flat @ fc_w.T + fc_b, 0.0)
    return h @ fc1_w.T + fc1_b


if __name__ == "__main__":
    key = jax.random.PRNGKey(0)
    ks = jax.random.split(key, 11)
    B = 2

    x = jax.random.normal(ks[0], (B, 1, H_IN, H_IN), jnp.float32)

    conv_w = jax.random.normal(ks[1], (C_OUT, 1, 3, 3), jnp.float32) * 0.3
    conv_b = 0.1 * jax.random.normal(ks[2], (C_OUT,), jnp.float32)
    gamma = 1.0 + 0.1 * jax.random.normal(ks[3], (C_OUT,), jnp.float32)
    beta = 0.1 * jax.random.normal(ks[4], (C_OUT,), jnp.float32)
    mean = 0.1 * jax.random.normal(ks[5], (C_OUT,), jnp.float32)
    var = jax.random.uniform(ks[6], (C_OUT,), jnp.float32, minval=0.5, maxval=1.5)
    fc_w = jax.random.normal(ks[7], (FC_H, C_OUT * H_POOL * H_POOL), jnp.float32) * (1.0 / 60.0)
    fc_b = 0.05 * jax.random.normal(ks[8], (FC_H,), jnp.float32)
    fc1_w = jax.random.normal(ks[9], (NUM_CLASSES, FC_H), jnp.float32) * (1.0 / 11.3)
    fc1_b = 0.05 * jax.random.normal(ks[10], (NUM_CLASSES,), jnp.float32)

    params = (conv_w, conv_b, gamma, beta, mean, var, fc_w, fc_b, fc1_w, fc1_b)

    prepped = prepare_dannet1_params(params)          # one-time weight prep
    out = jax.block_until_ready(dannet1_forward(x, prepped))
    ref = jax.block_until_ready(reference_forward(x, params))

    assert out.shape == (B, NUM_CLASSES), out.shape
    if not jnp.allclose(out, ref, atol=2e-2, rtol=2e-2):
        raise AssertionError(
            f"mismatch vs reference: max abs diff = {float(jnp.max(jnp.abs(out - ref)))}")
    print("KERNEL_OK")
</pallas_src>

<mosaic_0001>
module attributes {stable_mosaic.version = 11 : i64} {
  func.func @_fused_kernel(%arg0: i32, %arg1: memref<128x128xbf16, #tpu.memory_space<vmem>>, %arg2: memref<128x128xbf16, #tpu.memory_space<vmem>>, %arg3: memref<128x512xbf16, #tpu.memory_space<vmem>>, %arg4: memref<1x512xf32, #tpu.memory_space<vmem>>, %arg5: memref<15x256x128xbf16, #tpu.memory_space<vmem>>, %arg6: memref<1x128xf32, #tpu.memory_space<vmem>>, %arg7: memref<128x128xbf16, #tpu.memory_space<vmem>>, %arg8: memref<1x128xf32, #tpu.memory_space<vmem>>, %arg9: memref<8x128xf32, #tpu.memory_space<vmem>>) attributes {dimension_semantics = [#tpu.dimension_semantics<parallel>], iteration_bounds = array<i64: 1>, scalar_prefetch = 0 : i64, scratch_operands = 0 : i64, tpu.core_type = #tpu.core_type<tc>, window_params = [{transform_indices = @transform_0, window_bounds = array<i64: 128, 128>}, {transform_indices = @transform_1, window_bounds = array<i64: 128, 128>}, {pipeline_mode = #tpu.pipeline_mode<synchronous>, transform_indices = @transform_2, window_bounds = array<i64: 128, 512>}, {pipeline_mode = #tpu.pipeline_mode<synchronous>, transform_indices = @transform_3, window_bounds = array<i64: 1, 512>}, {pipeline_mode = #tpu.pipeline_mode<synchronous>, transform_indices = @transform_4, window_bounds = array<i64: 15, 256, 128>}, {pipeline_mode = #tpu.pipeline_mode<synchronous>, transform_indices = @transform_5, window_bounds = array<i64: 1, 128>}, {pipeline_mode = #tpu.pipeline_mode<synchronous>, transform_indices = @transform_6, window_bounds = array<i64: 128, 128>}, {pipeline_mode = #tpu.pipeline_mode<synchronous>, transform_indices = @transform_7, window_bounds = array<i64: 1, 128>}, {transform_indices = @transform_8, window_bounds = array<i64: 8, 128>}]} {
    %c0 = arith.constant 0 : index
    %c0_0 = arith.constant 0 : index
    %0 = vector.load %arg3[%c0, %c0_0] : memref<128x512xbf16, #tpu.memory_space<vmem>>, vector<128x512xbf16>
    %c0_1 = arith.constant 0 : index
    %c0_2 = arith.constant 0 : index
    %1 = vector.load %arg4[%c0_1, %c0_2] : memref<1x512xf32, #tpu.memory_space<vmem>>, vector<1x512xf32>
    %c0_3 = arith.constant 0 : index
    %c0_4 = arith.constant 0 : index
    %2 = vector.load %arg1[%c0_3, %c0_4] : memref<128x128xbf16, #tpu.memory_space<vmem>>, vector<128x128xbf16>
    %cst = arith.constant dense<0.000000e+00> : vector<128x512xf32>
    %3 = tpu.matmul %2, %0, %cst {dimension_numbers = #tpu.dot_dimension_numbers<[1], [0], [0], [1], [0, 0, 1, 1], [], []>} : vector<128x128xbf16>, vector<128x512xbf16>, vector<128x512xf32> -> vector<128x512xf32>
    %c0_5 = arith.constant 0 : index
    %c0_6 = arith.constant 0 : index
    %4 = vector.load %arg2[%c0_5, %c0_6] : memref<128x128xbf16, #tpu.memory_space<vmem>>, vector<128x128xbf16>
    %cst_7 = arith.constant dense<0.000000e+00> : vector<128x512xf32>
    %5 = tpu.matmul %4, %0, %cst_7 {dimension_numbers = #tpu.dot_dimension_numbers<[1], [0], [0], [1], [0, 0, 1, 1], [], []>} : vector<128x128xbf16>, vector<128x512xbf16>, vector<128x512xf32> -> vector<128x512xf32>
    %6 = vector.broadcast %1 : vector<1x512xf32> to vector<128x512xf32>
    %7 = arith.addf %3, %6 : vector<128x512xf32>
    %cst_8 = arith.constant 0.000000e+00 : f32
    %8 = vector.broadcast %cst_8 : f32 to vector<128x512xf32>
    %9 = arith.maximumf %7, %8 : vector<128x512xf32>
    %10 = vector.broadcast %1 : vector<1x512xf32> to vector<128x512xf32>
    %11 = arith.addf %5, %10 : vector<128x512xf32>
    %cst_9 = arith.constant 0.000000e+00 : f32
    %12 = vector.broadcast %cst_9 : f32 to vector<128x512xf32>
    %13 = arith.maximumf %11, %12 : vector<128x512xf32>
    %14 = vector.extract_strided_slice %9 {offsets = [0, 0], sizes = [128, 256], strides = [1, 1]} : vector<128x512xf32> to vector<128x256xf32>
    %15 = vector.extract_strided_slice %9 {offsets = [0, 256], sizes = [128, 256], strides = [1, 1]} : vector<128x512xf32> to vector<128x256xf32>
    %16 = arith.maximumf %14, %15 : vector<128x256xf32>
    %17 = vector.extract_strided_slice %13 {offsets = [0, 0], sizes = [128, 256], strides = [1, 1]} : vector<128x512xf32> to vector<128x256xf32>
    %18 = vector.extract_strided_slice %13 {offsets = [0, 256], sizes = [128, 256], strides = [1, 1]} : vector<128x512xf32> to vector<128x256xf32>
    %19 = arith.maximumf %17, %18 : vector<128x256xf32>
    %20 = arith.maximumf %16, %19 : vector<128x256xf32>
    %21 = arith.truncf %20 : vector<128x256xf32> to vector<128x256xbf16>
    %cst_10 = arith.constant 0.000000e+00 : f32
    %22 = vector.broadcast %cst_10 : f32 to vector<8x128xf32>
    %23 = vector.extract_strided_slice %21 {offsets = [0, 0], sizes = [8, 256], strides = [1, 1]} : vector<128x256xbf16> to vector<8x256xbf16>
    %c0_11 = arith.constant 0 : index
    %c0_12 = arith.constant 0 : index
    %c0_13 = arith.constant 0 : index
    %24 = vector.load %arg5[%c0_11, %c0_12, %c0_13] : memref<15x256x128xbf16, #tpu.memory_space<vmem>>, vector<1x256x128xbf16>
    %25 = vector.shape_cast %24 : vector<1x256x128xbf16> to vector<256x128xbf16>
    %cst_14 = arith.constant dense<0.000000e+00> : vector<8x128xf32>
    %26 = tpu.matmul %23, %25, %cst_14 {dimension_numbers = #tpu.dot_dimension_numbers<[1], [0], [0], [1], [0, 0, 1, 1], [], []>} : vector<8x256xbf16>, vector<256x128xbf16>, vector<8x128xf32> -> vector<8x128xf32>
    %27 = arith.addf %22, %26 : vector<8x128xf32>
    %28 = vector.extract_strided_slice %21 {offsets = [8, 0], sizes = [8, 256], strides = [1, 1]} : vector<128x256xbf16> to vector<8x256xbf16>
    %c1 = arith.constant 1 : index
    %c0_15 = arith.constant 0 : index
    %c0_16 = arith.constant 0 : index
    %29 = vector.load %arg5[%c1, %c0_15, %c0_16] : memref<15x256x128xbf16, #tpu.memory_space<vmem>>, vector<1x256x128xbf16>
    %30 = vector.shape_cast %29 : vector<1x256x128xbf16> to vector<256x128xbf16>
    %cst_17 = arith.constant dense<0.000000e+00> : vector<8x128xf32>
    %31 = tpu.matmul %28, %30, %cst_17 {dimension_numbers = #tpu.dot_dimension_numbers<[1], [0], [0], [1], [0, 0, 1, 1], [], []>} : vector<8x256xbf16>, vector<256x128xbf16>, vector<8x128xf32> -> vector<8x128xf32>
    %32 = arith.addf %27, %31 : vector<8x128xf32>
    %33 = vector.extract_strided_slice %21 {offsets = [16, 0], sizes = [8, 256], strides = [1, 1]} : vector<128x256xbf16> to vector<8x256xbf16>
    %c2 = arith.constant 2 : index
    %c0_18 = arith.constant 0 : index
    %c0_19 = arith.constant 0 : index
    %34 = vector.load %arg5[%c2, %c0_18, %c0_19] : memref<15x256x128xbf16, #tpu.memory_space<vmem>>, vector<1x256x128xbf16>
    %35 = vector.shape_cast %34 : vector<1x256x128xbf16> to vector<256x128xbf16>
    %cst_20 = arith.constant dense<0.000000e+00> : vector<8x128xf32>
    %36 = tpu.matmul %33, %35, %cst_20 {dimension_numbers = #tpu.dot_dimension_numbers<[1], [0], [0], [1], [0, 0, 1, 1], [], []>} : vector<8x256xbf16>, vector<256x128xbf16>, vector<8x128xf32> -> vector<8x128xf32>
    %37 = arith.addf %32, %36 : vector<8x128xf32>
    %38 = vector.extract_strided_slice %21 {offsets = [24, 0], sizes = [8, 256], strides = [1, 1]} : vector<128x256xbf16> to vector<8x256xbf16>
    %c3 = arith.constant 3 : index
    %c0_21 = arith.constant 0 : index
    %c0_22 = arith.constant 0 : index
    %39 = vector.load %arg5[%c3, %c0_21, %c0_22] : memref<15x256x128xbf16, #tpu.memory_space<vmem>>, vector<1x256x128xbf16>
    %40 = vector.shape_cast %39 : vector<1x256x128xbf16> to vector<256x128xbf16>
    %cst_23 = arith.constant dense<0.000000e+00> : vector<8x128xf32>
    %41 = tpu.matmul %38, %40, %cst_23 {dimension_numbers = #tpu.dot_dimension_numbers<[1], [0], [0], [1], [0, 0, 1, 1], [], []>} : vector<8x256xbf16>, vector<256x128xbf16>, vector<8x128xf32> -> vector<8x128xf32>
    %42 = arith.addf %37, %41 : vector<8x128xf32>
    %43 = vector.extract_strided_slice %21 {offsets = [32, 0], sizes = [8, 256], strides = [1, 1]} : vector<128x256xbf16> to vector<8x256xbf16>
    %c4 = arith.constant 4 : index
    %c0_24 = arith.constant 0 : index
    %c0_25 = arith.constant 0 : index
    %44 = vector.load %arg5[%c4, %c0_24, %c0_25] : memref<15x256x128xbf16, #tpu.memory_space<vmem>>, vector<1x256x128xbf16>
    %45 = vector.shape_cast %44 : vector<1x256x128xbf16> to vector<256x128xbf16>
    %cst_26 = arith.constant dense<0.000000e+00> : vector<8x128xf32>
    %46 = tpu.matmul %43, %45, %cst_26 {dimension_numbers = #tpu.dot_dimension_numbers<[1], [0], [0], [1], [0, 0, 1, 1], [], []>} : vector<8x256xbf16>, vector<256x128xbf16>, vector<8x128xf32> -> vector<8x128xf32>
    %47 = arith.addf %42, %46 : vector<8x128xf32>
    %48 = vector.extract_strided_slice %21 {offsets = [40, 0], sizes = [8, 256], strides = [1, 1]} : vector<128x256xbf16> to vector<8x256xbf16>
    %c5 = arith.constant 5 : index
    %c0_27 = arith.constant 0 : index
    %c0_28 = arith.constant 0 : index
    %49 = vector.load %arg5[%c5, %c0_27, %c0_28] : memref<15x256x128xbf16, #tpu.memory_space<vmem>>, vector<1x256x128xbf16>
    %50 = vector.shape_cast %49 : vector<1x256x128xbf16> to vector<256x128xbf16>
    %cst_29 = arith.constant dense<0.000000e+00> : vector<8x128xf32>
    %51 = tpu.matmul %48, %50, %cst_29 {dimension_numbers = #tpu.dot_dimension_numbers<[1], [0], [0], [1], [0, 0, 1, 1], [], []>} : vector<8x256xbf16>, vector<256x128xbf16>, vector<8x128xf32> -> vector<8x128xf32>
    %52 = arith.addf %47, %51 : vector<8x128xf32>
    %53 = vector.extract_strided_slice %21 {offsets = [48, 0], sizes = [8, 256], strides = [1, 1]} : vector<128x256xbf16> to vector<8x256xbf16>
    %c6 = arith.constant 6 : index
    %c0_30 = arith.constant 0 : index
    %c0_31 = arith.constant 0 : index
    %54 = vector.load %arg5[%c6, %c0_30, %c0_31] : memref<15x256x128xbf16, #tpu.memory_space<vmem>>, vector<1x256x128xbf16>
    %55 = vector.shape_cast %54 : vector<1x256x128xbf16> to vector<256x128xbf16>
    %cst_32 = arith.constant dense<0.000000e+00> : vector<8x128xf32>
    %56 = tpu.matmul %53, %55, %cst_32 {dimension_numbers = #tpu.dot_dimension_numbers<[1], [0], [0], [1], [0, 0, 1, 1], [], []>} : vector<8x256xbf16>, vector<256x128xbf16>, vector<8x128xf32> -> vector<8x128xf32>
    %57 = arith.addf %52, %56 : vector<8x128xf32>
    %58 = vector.extract_strided_slice %21 {offsets = [56, 0], sizes = [8, 256], strides = [1, 1]} : vector<128x256xbf16> to vector<8x256xbf16>
    %c7 = arith.constant 7 : index
    %c0_33 = arith.constant 0 : index
    %c0_34 = arith.constant 0 : index
    %59 = vector.load %arg5[%c7, %c0_33, %c0_34] : memref<15x256x128xbf16, #tpu.memory_space<vmem>>, vector<1x256x128xbf16>
    %60 = vector.shape_cast %59 : vector<1x256x128xbf16> to vector<256x128xbf16>
    %cst_35 = arith.constant dense<0.000000e+00> : vector<8x128xf32>
    %61 = tpu.matmul %58, %60, %cst_35 {dimension_numbers = #tpu.dot_dimension_numbers<[1], [0], [0], [1], [0, 0, 1, 1], [], []>} : vector<8x256xbf16>, vector<256x128xbf16>, vector<8x128xf32> -> vector<8x128xf32>
    %62 = arith.addf %57, %61 : vector<8x128xf32>
    %63 = vector.extract_strided_slice %21 {offsets = [64, 0], sizes = [8, 256], strides = [1, 1]} : vector<128x256xbf16> to vector<8x256xbf16>
    %c8 = arith.constant 8 : index
    %c0_36 = arith.constant 0 : index
    %c0_37 = arith.constant 0 : index
    %64 = vector.load %arg5[%c8, %c0_36, %c0_37] : memref<15x256x128xbf16, #tpu.memory_space<vmem>>, vector<1x256x128xbf16>
    %65 = vector.shape_cast %64 : vector<1x256x128xbf16> to vector<256x128xbf16>
    %cst_38 = arith.constant dense<0.000000e+00> : vector<8x128xf32>
    %66 = tpu.matmul %63, %65, %cst_38 {dimension_numbers = #tpu.dot_dimension_numbers<[1], [0], [0], [1], [0, 0, 1, 1], [], []>} : vector<8x256xbf16>, vector<256x128xbf16>, vector<8x128xf32> -> vector<8x128xf32>
    %67 = arith.addf %62, %66 : vector<8x128xf32>
    %68 = vector.extract_strided_slice %21 {offsets = [72, 0], sizes = [8, 256], strides = [1, 1]} : vector<128x256xbf16> to vector<8x256xbf16>
    %c9 = arith.constant 9 : index
    %c0_39 = arith.constant 0 : index
    %c0_40 = arith.constant 0 : index
    %69 = vector.load %arg5[%c9, %c0_39, %c0_40] : memref<15x256x128xbf16, #tpu.memory_space<vmem>>, vector<1x256x128xbf16>
    %70 = vector.shape_cast %69 : vector<1x256x128xbf16> to vector<256x128xbf16>
    %cst_41 = arith.constant dense<0.000000e+00> : vector<8x128xf32>
    %71 = tpu.matmul %68, %70, %cst_41 {dimension_numbers = #tpu.dot_dimension_numbers<[1], [0], [0], [1], [0, 0, 1, 1], [], []>} : vector<8x256xbf16>, vector<256x128xbf16>, vector<8x128xf32> -> vector<8x128xf32>
    %72 = arith.addf %67, %71 : vector<8x128xf32>
    %73 = vector.extract_strided_slice %21 {offsets = [80, 0], sizes = [8, 256], strides = [1, 1]} : vector<128x256xbf16> to vector<8x256xbf16>
    %c10 = arith.constant 10 : index
    %c0_42 = arith.constant 0 : index
    %c0_43 = arith.constant 0 : index
    %74 = vector.load %arg5[%c10, %c0_42, %c0_43] : memref<15x256x128xbf16, #tpu.memory_space<vmem>>, vector<1x256x128xbf16>
    %75 = vector.shape_cast %74 : vector<1x256x128xbf16> to vector<256x128xbf16>
    %cst_44 = arith.constant dense<0.000000e+00> : vector<8x128xf32>
    %76 = tpu.matmul %73, %75, %cst_44 {dimension_numbers = #tpu.dot_dimension_numbers<[1], [0], [0], [1], [0, 0, 1, 1], [], []>} : vector<8x256xbf16>, vector<256x128xbf16>, vector<8x128xf32> -> vector<8x128xf32>
    %77 = arith.addf %72, %76 : vector<8x128xf32>
    %78 = vector.extract_strided_slice %21 {offsets = [88, 0], sizes = [8, 256], strides = [1, 1]} : vector<128x256xbf16> to vector<8x256xbf16>
    %c11 = arith.constant 11 : index
    %c0_45 = arith.constant 0 : index
    %c0_46 = arith.constant 0 : index
    %79 = vector.load %arg5[%c11, %c0_45, %c0_46] : memref<15x256x128xbf16, #tpu.memory_space<vmem>>, vector<1x256x128xbf16>
    %80 = vector.shape_cast %79 : vector<1x256x128xbf16> to vector<256x128xbf16>
    %cst_47 = arith.constant dense<0.000000e+00> : vector<8x128xf32>
    %81 = tpu.matmul %78, %80, %cst_47 {dimension_numbers = #tpu.dot_dimension_numbers<[1], [0], [0], [1], [0, 0, 1, 1], [], []>} : vector<8x256xbf16>, vector<256x128xbf16>, vector<8x128xf32> -> vector<8x128xf32>
    %82 = arith.addf %77, %81 : vector<8x128xf32>
    %83 = vector.extract_strided_slice %21 {offsets = [96, 0], sizes = [8, 256], strides = [1, 1]} : vector<128x256xbf16> to vector<8x256xbf16>
    %c12 = arith.constant 12 : index
    %c0_48 = arith.constant 0 : index
    %c0_49 = arith.constant 0 : index
    %84 = vector.load %arg5[%c12, %c0_48, %c0_49] : memref<15x256x128xbf16, #tpu.memory_space<vmem>>, vector<1x256x128xbf16>
    %85 = vector.shape_cast %84 : vector<1x256x128xbf16> to vector<256x128xbf16>
    %cst_50 = arith.constant dense<0.000000e+00> : vector<8x128xf32>
    %86 = tpu.matmul %83, %85, %cst_50 {dimension_numbers = #tpu.dot_dimension_numbers<[1], [0], [0], [1], [0, 0, 1, 1], [], []>} : vector<8x256xbf16>, vector<256x128xbf16>, vector<8x128xf32> -> vector<8x128xf32>
    %87 = arith.addf %82, %86 : vector<8x128xf32>
    %88 = vector.extract_strided_slice %21 {offsets = [104, 0], sizes = [8, 256], strides = [1, 1]} : vector<128x256xbf16> to vector<8x256xbf16>
    %c13 = arith.constant 13 : index
    %c0_51 = arith.constant 0 : index
    %c0_52 = arith.constant 0 : index
    %89 = vector.load %arg5[%c13, %c0_51, %c0_52] : memref<15x256x128xbf16, #tpu.memory_space<vmem>>, vector<1x256x128xbf16>
    %90 = vector.shape_cast %89 : vector<1x256x128xbf16> to vector<256x128xbf16>
    %cst_53 = arith.constant dense<0.000000e+00> : vector<8x128xf32>
    %91 = tpu.matmul %88, %90, %cst_53 {dimension_numbers = #tpu.dot_dimension_numbers<[1], [0], [0], [1], [0, 0, 1, 1], [], []>} : vector<8x256xbf16>, vector<256x128xbf16>, vector<8x128xf32> -> vector<8x128xf32>
    %92 = arith.addf %87, %91 : vector<8x128xf32>
    %93 = vector.extract_strided_slice %21 {offsets = [112, 0], sizes = [8, 256], strides = [1, 1]} : vector<128x256xbf16> to vector<8x256xbf16>
    %c14 = arith.constant 14 : index
    %c0_54 = arith.constant 0 : index
    %c0_55 = arith.constant 0 : index
    %94 = vector.load %arg5[%c14, %c0_54, %c0_55] : memref<15x256x128xbf16, #tpu.memory_space<vmem>>, vector<1x256x128xbf16>
    %95 = vector.shape_cast %94 : vector<1x256x128xbf16> to vector<256x128xbf16>
    %cst_56 = arith.constant dense<0.000000e+00> : vector<8x128xf32>
    %96 = tpu.matmul %93, %95, %cst_56 {dimension_numbers = #tpu.dot_dimension_numbers<[1], [0], [0], [1], [0, 0, 1, 1], [], []>} : vector<8x256xbf16>, vector<256x128xbf16>, vector<8x128xf32> -> vector<8x128xf32>
    %97 = arith.addf %92, %96 : vector<8x128xf32>
    %c0_57 = arith.constant 0 : index
    %c0_58 = arith.constant 0 : index
    %98 = vector.load %arg6[%c0_57, %c0_58] : memref<1x128xf32, #tpu.memory_space<vmem>>, vector<1x128xf32>
    %99 = vector.broadcast %98 : vector<1x128xf32> to vector<8x128xf32>
    %100 = arith.addf %97, %99 : vector<8x128xf32>
    %cst_59 = arith.constant 0.000000e+00 : f32
    %101 = vector.broadcast %cst_59 : f32 to vector<8x128xf32>
    %102 = arith.maximumf %100, %101 : vector<8x128xf32>
    %103 = arith.truncf %102 : vector<8x128xf32> to vector<8x128xbf16>
    %c0_60 = arith.constant 0 : index
    %c0_61 = arith.constant 0 : index
    %104 = vector.load %arg7[%c0_60, %c0_61] : memref<128x128xbf16, #tpu.memory_space<vmem>>, vector<128x128xbf16>
    %cst_62 = arith.constant dense<0.000000e+00> : vector<8x128xf32>
    %105 = tpu.matmul %103, %104, %cst_62 {dimension_numbers = #tpu.dot_dimension_numbers<[1], [0], [0], [1], [0, 0, 1, 1], [], []>} : vector<8x128xbf16>, vector<128x128xbf16>, vector<8x128xf32> -> vector<8x128xf32>
    %c0_63 = arith.constant 0 : index
    %c0_64 = arith.constant 0 : index
    %106 = vector.load %arg8[%c0_63, %c0_64] : memref<1x128xf32, #tpu.memory_space<vmem>>, vector<1x128xf32>
    %107 = vector.broadcast %106 : vector<1x128xf32> to vector<8x128xf32>
    %108 = arith.addf %105, %107 : vector<8x128xf32>
    %c0_65 = arith.constant 0 : index
    %c0_66 = arith.constant 0 : index
    %109 = vector.load %arg9[%c0_65, %c0_66] : memref<8x128xf32, #tpu.memory_space<vmem>>, vector<8x128xf32>
    tpu.vector_store %arg9[%c0_65, %c0_66], %108 {strides = array<i32>} : memref<8x128xf32, #tpu.memory_space<vmem>>, vector<8x128xf32>,
    return
  }
  func.func @transform_0(%arg0: i32) -> (i32, i32) {
    %c0_i32 = arith.constant 0 : i32
    %c0_i32_0 = arith.constant 0 : i32
    return %arg0, %c0_i32 : i32, i32
  }
  func.func @transform_1(%arg0: i32) -> (i32, i32) {
    %c0_i32 = arith.constant 0 : i32
    %c0_i32_0 = arith.constant 0 : i32
    return %arg0, %c0_i32 : i32, i32
  }
  func.func @transform_2(%arg0: i32) -> (i32, i32) {
    %c0_i32 = arith.constant 0 : i32
    %c0_i32_0 = arith.constant 0 : i32
    %c0_i32_1 = arith.constant 0 : i32
    return %c0_i32, %c0_i32_0 : i32, i32
  }
  func.func @transform_3(%arg0: i32) -> (i32, i32) {
    %c0_i32 = arith.constant 0 : i32
    %c0_i32_0 = arith.constant 0 : i32
    %c0_i32_1 = arith.constant 0 : i32
    return %c0_i32, %c0_i32_0 : i32, i32
  }
  func.func @transform_4(%arg0: i32) -> (i32, i32, i32) {
    %c0_i32 = arith.constant 0 : i32
    %c0_i32_0 = arith.constant 0 : i32
    %c0_i32_1 = arith.constant 0 : i32
    %c0_i32_2 = arith.constant 0 : i32
    return %c0_i32, %c0_i32_0, %c0_i32_1 : i32, i32, i32
  }
  func.func @transform_5(%arg0: i32) -> (i32, i32) {
    %c0_i32 = arith.constant 0 : i32
    %c0_i32_0 = arith.constant 0 : i32
    %c0_i32_1 = arith.constant 0 : i32
    return %c0_i32, %c0_i32_0 : i32, i32
  }
  func.func @transform_6(%arg0: i32) -> (i32, i32) {
    %c0_i32 = arith.constant 0 : i32
    %c0_i32_0 = arith.constant 0 : i32
    %c0_i32_1 = arith.constant 0 : i32
    return %c0_i32, %c0_i32_0 : i32, i32
  }
  func.func @transform_7(%arg0: i32) -> (i32, i32) {
    %c0_i32 = arith.constant 0 : i32
    %c0_i32_0 = arith.constant 0 : i32
    %c0_i32_1 = arith.constant 0 : i32
    return %c0_i32, %c0_i32_0 : i32, i32
  }
  func.func @transform_8(%arg0: i32) -> (i32, i32) {
    %c0_i32 = arith.constant 0 : i32
    %c0_i32_0 = arith.constant 0 : i32
    return %arg0, %c0_i32 : i32, i32
  }
}

</mosaic_0001>

<bundles_post_ra>
// kernel: dannet1_forward.1
= control target key start
LH: loop header
LB: loop body
LE: loop exit
PB: predicated region body
PF: predicated region fallthrough
CT: control target
= control target key end

     0   :  { %v5199_v1 = vmov 0   ;;  %vm5201_vm0 = vmmov 0   ;;  %s6545_s2 = inlined_call_operand.vmem [shape: bf16[128,512], index: 2, kind: input, shape index: {}]   ;;  %s6546_s0 = inlined_call_operand.vmem [shape: bf16[128,128], index: 0, kind: input, shape index: {}]   ;;  %s6547_s1 = inlined_call_operand.vmem [shape: bf16[128,128], index: 1, kind: input, shape index: {}]   ;;  %s6548_s4 = inlined_call_operand.vmem [shape: bf16[15,256,128], index: 4, kind: input, shape index: {}]   ;;  %s6549_s3 = inlined_call_operand.vmem [shape: f32[1,512], index: 3, kind: input, shape index: {}]   ;;  %s6550_s6 = inlined_call_operand.vmem [shape: bf16[128,128], index: 6, kind: input, shape index: {}]   ;;  %s6551_s5 = inlined_call_operand.vmem [shape: f32[1,128], index: 5, kind: input, shape index: {}]   ;;  %s6552_s7 = inlined_call_operand.vmem [shape: f32[1,128], index: 7, kind: input, shape index: {}]   ;;  %s6553_s8 = inlined_call_operand.vmem [shape: f32[8,128], index: 8, kind: output, shape index: {}]  }
   0x1   :  { %v5250_v0 = vld [vmem:[%s6545_s2 + $0xe4] ss:$16 sps:$4 sm:$0xff]   ;;  %356 = vmatprep.mubr.bf16.mxu0 %v5199_v1  ;;  %469 = vmatprep.mubr.bf16.mxu1 %v5199_v1  ;;  %v5257_v2 = vld [vmem:[%s6545_s2 + $0xec] ss:$16 sps:$4 sm:$0xff]   ;;  %v5263_v3 = vld [vmem:[%s6545_s2 + $0xe0] ss:$16 sps:$4 sm:$0xff]  }
   0x2   :  { %324 = vmatprep.subr.bf16.mxu0 %v5250_v0  ;;  %v5268_v4 = vld [vmem:[%s6545_s2 + $0xe8] ss:$16 sps:$4 sm:$0xff]   ;;  %437 = vmatprep.subr.bf16.mxu1 %v5257_v2  ;;  %v5274_v5 = vld [vmem:[%s6545_s2 + $0xc4] ss:$16 sps:$4 sm:$0xff]   ;;  %v5281_v6 = vld [vmem:[%s6545_s2 + $0xcc] ss:$16 sps:$4 sm:$0xff]  }
   0x3   :  { %325 = vmatpush1.bf16.msra.mxu0 %v5263_v3  ;;  %438 = vmatpush1.bf16.msra.mxu1 %v5268_v4  ;;  %v5286_v7 = vld [vmem:[%s6545_s2 + $0xc0] ss:$16 sps:$4 sm:$0xff]   ;;  %v5292_v8 = vld [vmem:[%s6545_s2 + $0xc8] ss:$16 sps:$4 sm:$0xff]   ;;  %v5298_v9 = vld [vmem:[%s6545_s2 + $0xa4] ss:$16 sps:$4 sm:$0xff]  }
   0x4   :  { %326 = vmatprep.subr.bf16.mxu0 %v5274_v5  ;;  %439 = vmatprep.subr.bf16.mxu1 %v5281_v6  ;;  %v5303_v10 = vld [vmem:[%s6545_s2 + $0xac] ss:$16 sps:$4 sm:$0xff]   ;;  %v5308_v11 = vld [vmem:[%s6545_s2 + $0xa0] ss:$16 sps:$4 sm:$0xff]   ;;  %v5313_v12 = vld [vmem:[%s6545_s2 + $0xa8] ss:$16 sps:$4 sm:$0xff]  }
   0x5   :  { %v5320_v13 = vld [vmem:[%s6545_s2 + $0x84] ss:$16 sps:$4 sm:$0xff]   ;;  %v5327_v14 = vld [vmem:[%s6545_s2 + $0x8c] ss:$16 sps:$4 sm:$0xff]   ;;  %v5332_v15 = vld [vmem:[%s6545_s2 + $0x80] ss:$16 sps:$4 sm:$0xff]  }
   0x6   :  { %v5339_v16 = vld [vmem:[%s6545_s2 + $0x88] ss:$16 sps:$4 sm:$0xff]   ;;  %v5344_v17 = vld [vmem:[%s6545_s2 + $0x64] ss:$16 sps:$4 sm:$0xff]   ;;  %v4913_v18 = vld [vmem:[%s6545_s2 + $0x6c] ss:$16 sps:$4 sm:$0xff]  }
   0x7   :  { %327 = vmatpush1.bf16.msra.mxu0 %v5286_v7  ;;  %440 = vmatpush1.bf16.msra.mxu1 %v5292_v8  ;;  %v5354_v19 = vld [vmem:[%s6545_s2 + $0x60] ss:$16 sps:$4 sm:$0xff]   ;;  %v5359_v20 = vld [vmem:[%s6545_s2 + $0x68] ss:$16 sps:$4 sm:$0xff]   ;;  %v5366_v21 = vld [vmem:[%s6545_s2 + $0x44] ss:$16 sps:$4 sm:$0xff]  }
   0x8   :  { %328 = vmatprep.subr.bf16.mxu0 %v5298_v9  ;;  %441 = vmatprep.subr.bf16.mxu1 %v5303_v10  ;;  %v4919_v22 = vld [vmem:[%s6545_s2 + $0x4c] ss:$16 sps:$4 sm:$0xff]   ;;  %v5375_v23 = vld [vmem:[%s6545_s2 + $0x40] ss:$16 sps:$4 sm:$0xff]   ;;  %v4922_v24 = vld [vmem:[%s6545_s2 + $0x48] ss:$16 sps:$4 sm:$0xff]  }
   0x9   :  { %v4923_v25 = vld [vmem:[%s6545_s2 + $0x24] ss:$16 sps:$4 sm:$0xff]   ;;  %v4925_v26 = vld [vmem:[%s6545_s2 + $0x2c] ss:$16 sps:$4 sm:$0xff]   ;;  %v4927_v27 = vld [vmem:[%s6545_s2 + $0x20] ss:$16 sps:$4 sm:$0xff]  }
   0xa   :  { %v4928_v28 = vld [vmem:[%s6545_s2 + $0x28] ss:$16 sps:$4 sm:$0xff]   ;;  %v4929_v29 = vld [vmem:[%s6545_s2 + $0x4] ss:$16 sps:$4 sm:$0xff]   ;;  %v4931_v30 = vld [vmem:[%s6545_s2 + $0xc] ss:$16 sps:$4 sm:$0xff]  }
   0xb   :  { %329 = vmatpush1.bf16.msra.mxu0 %v5308_v11  ;;  %442 = vmatpush1.bf16.msra.mxu1 %v5313_v12  ;;  %v4933_v31 = vld [vmem:[%s6545_s2] ss:$16 sps:$4 sm:$0xff]   ;;  %v4934_v32 = vld [vmem:[%s6545_s2 + $0x8] ss:$16 sps:$4 sm:$0xff]  }
   0xc   :  { %330 = vmatprep.subr.bf16.mxu0 %v5320_v13  ;;  %443 = vmatprep.subr.bf16.mxu1 %v5327_v14  ;;  %v4935_v33 = vld [vmem:[%s6546_s0] sm:$0xff]   ;;  %v4936_v34 = vld [vmem:[%s6546_s0 + $0x8] sm:$0xff]   ;;  %v4937_v35 = vld [vmem:[%s6546_s0 + $0x10] sm:$0xff]  }
   0xd   :  { %v4938_v36 = vld [vmem:[%s6546_s0 + $0x18] sm:$0xff]   ;;  %v4939_v37 = vld [vmem:[%s6546_s0 + $0x20] sm:$0xff]   ;;  %v4940_v38 = vld [vmem:[%s6546_s0 + $0x28] sm:$0xff]  }
   0xe   :  { %v4941_v39 = vld [vmem:[%s6546_s0 + $0x30] sm:$0xff]   ;;  %v4942_v40 = vld [vmem:[%s6546_s0 + $0x38] sm:$0xff]   ;;  %v4943_v41 = vld [vmem:[%s6547_s1] sm:$0xff]  }
   0xf   :  { %331 = vmatpush1.bf16.msra.mxu0 %v5332_v15  ;;  %444 = vmatpush1.bf16.msra.mxu1 %v5339_v16  ;;  %v4944_v42 = vld [vmem:[%s6547_s1 + $0x8] sm:$0xff]   ;;  %v4945_v43 = vld [vmem:[%s6547_s1 + $0x10] sm:$0xff]   ;;  %v4946_v44 = vld [vmem:[%s6547_s1 + $0x18] sm:$0xff]  }
  0x10   :  { %332 = vmatprep.subr.bf16.mxu0 %v5344_v17  ;;  %445 = vmatprep.subr.bf16.mxu1 %v4913_v18  ;;  %v4947_v45 = vld [vmem:[%s6547_s1 + $0x20] sm:$0xff]   ;;  %v4951_v46 = vld [vmem:[%s6548_s4 + $0xf8] sm:$0xff]   ;;  %v4948_v48 = vld [vmem:[%s6547_s1 + $0x28] sm:$0xff]  }
  0x11   :  { %v4952_v47 = vld [vmem:[%s6548_s4 + $0xb8] sm:$0xff]   ;;  %v4953_v49 = vld [vmem:[%s6548_s4 + $0xf0] sm:$0xff]   ;;  %v4955_v51 = vld [vmem:[%s6548_s4 + $0xe8] sm:$0xff]  }
  0x12   :  { %v4954_v50 = vld [vmem:[%s6548_s4 + $0xb0] sm:$0xff]   ;;  %v4956_v52 = vld [vmem:[%s6548_s4 + $0xa8] sm:$0xff]   ;;  %v4959_v54 = vld [vmem:[%s6548_s4 + $0x78] sm:$0xff]  }
  0x13   :  { %333 = vmatpush1.bf16.msra.mxu0 %v5354_v19  ;;  %446 = vmatpush1.bf16.msra.mxu1 %v5359_v20  ;;  %v4949_v53 = vld [vmem:[%s6547_s1 + $0x30] sm:$0xff]   ;;  %v4957_v55 = vld [vmem:[%s6548_s4 + $0xe0] sm:$0xff]   ;;  %v4960_v57 = vld [vmem:[%s6548_s4 + $0x38] sm:$0xff]  }
  0x14   :  { %334 = vmatprep.subr.bf16.mxu0 %v5366_v21  ;;  %447 = vmatprep.subr.bf16.mxu1 %v4919_v22  ;;  %v4958_v56 = vld [vmem:[%s6548_s4 + $0xa0] sm:$0xff]   ;;  %v4950_v58 = vld [vmem:[%s6547_s1 + $0x38] sm:$0xff]   ;;  %v4963_v59 = vld [vmem:[%s6548_s4 + $0x70] sm:$0xff]  }
  0x15   :  { %v4964_v60 = vld [vmem:[%s6548_s4 + $0x30] sm:$0xff]   ;;  %v4965_v61 = vld [vmem:[%s6548_s4 + $0x68] sm:$0xff]   ;;  %v4961_v63 = vld [vmem:[%s6548_s4 + $0xd8] sm:$0xff]  }
  0x16   :  { %v4966_v62 = vld [vmem:[%s6548_s4 + $0x28] sm:$0xff]  }
  0x17   :  { %335 = vmatpush1.bf16.msra.mxu0 %v5375_v23  ;;  %448 = vmatpush1.bf16.msra.mxu1 %v4922_v24 }
  0x18   :  { %336 = vmatprep.subr.bf16.mxu0 %v4923_v25  ;;  %449 = vmatprep.subr.bf16.mxu1 %v4925_v26 }
  0x1b   :  { %337 = vmatpush1.bf16.msra.mxu0 %v4927_v27  ;;  %450 = vmatpush1.bf16.msra.mxu1 %v4928_v28 }
  0x1c   :  { %338 = vmatprep.subr.bf16.mxu0 %v4929_v29  ;;  %451 = vmatprep.subr.bf16.mxu1 %v4931_v30 }
  0x1f   :  { %339 = vmatpush1.bf16.msra.mxu0 %v4933_v31  ;;  %452 = vmatpush1.bf16.msra.mxu1 %v4934_v32 }
  0x20   :  { %662 = vmatprep.subr.bf16.mxu0 %v5250_v0  ;;  %775 = vmatprep.subr.bf16.mxu1 %v5257_v2  ;;  %v4962_v0 = vld [vmem:[%s6548_s4 + $0x98] sm:$0xff]   ;;  %v4970_v2 = vld [vmem:[%s6548_s4 + $0x20] sm:$0xff]  }
  0x22   :  { %357 = vmatmul.mubr.bf16.vlgmr.msra.gmra.mxu0 %v4935_v33  ;;  %470 = vmatmul.mubr.bf16.vlgmr.msra.gmra.mxu1 %v4935_v33 }
  0x23   :  { %663 = vmatpush1.bf16.msra.mxu0 %v5263_v3  ;;  %776 = vmatpush1.bf16.msra.mxu1 %v5268_v4  ;;  %v4971_v3 = vld [vmem:[%s6548_s4 + $0x58] sm:$0xff]   ;;  %v4967_v4 = vld [vmem:[%s6548_s4 + $0xd0] sm:$0xff]  }
  0x24   :  { %366 = vmatprep.mubr.bf16.mxu0 %v5199_v1  ;;  %479 = vmatprep.mubr.bf16.mxu1 %v5199_v1 }
  0x25   :  { %664 = vmatprep.subr.bf16.mxu0 %v5274_v5  ;;  %777 = vmatprep.subr.bf16.mxu1 %v5281_v6  ;;  %v4968_v5 = vld [vmem:[%s6548_s4 + $0x90] sm:$0xff]   ;;  %v4972_v6 = vld [vmem:[%s6548_s4 + $0x18] sm:$0xff]  }
  0x27   :  { %665 = vmatpush1.bf16.msra.mxu0 %v5286_v7  ;;  %778 = vmatpush1.bf16.msra.mxu1 %v5292_v8  ;;  %v4975_v7 = vld [vmem:[%s6548_s4 + $0x50] sm:$0xff]  }
  0x28   :  { %666 = vmatprep.subr.bf16.mxu0 %v5298_v9  ;;  %779 = vmatprep.subr.bf16.mxu1 %v5303_v10  ;;  %v4976_v8 = vld [vmem:[%s6548_s4 + $0x10] sm:$0xff]   ;;  %v4977_v9 = vld [vmem:[%s6548_s4 + $0x48] sm:$0xff]  }
  0x29   :  { %v4978_v10 = vld [vmem:[%s6548_s4 + $0x8] sm:$0xff]  }
  0x2a   :  { %367 = vmatmul.mubr.bf16.gmra.mxu0 %v4936_v34  ;;  %480 = vmatmul.mubr.bf16.gmra.mxu1 %v4936_v34 }
  0x2b   :  { %376 = vmatprep.mubr.bf16.mxu0 %v5199_v1  ;;  %489 = vmatprep.mubr.bf16.mxu1 %v5199_v1 }
  0x2c   :  { %667 = vmatpush1.bf16.msra.mxu0 %v5308_v11  ;;  %780 = vmatpush1.bf16.msra.mxu1 %v5313_v12  ;;  %v4973_v11 = vld [vmem:[%s6548_s4 + $0xc8] sm:$0xff]  }
  0x2d   :  { %668 = vmatprep.subr.bf16.mxu0 %v5320_v13  ;;  %781 = vmatprep.subr.bf16.mxu1 %v5327_v14  ;;  %v4974_v12 = vld [vmem:[%s6548_s4 + $0x88] sm:$0xff]   ;;  %v4981_v13 = vld [vmem:[%s6548_s4 + $0x40] sm:$0xff]  }
  0x2e   :  { %v4982_v14 = vld [vmem:[%s6548_s4] sm:$0xff]  }
  0x30   :  { %669 = vmatpush1.bf16.msra.mxu0 %v5332_v15  ;;  %782 = vmatpush1.bf16.msra.mxu1 %v5339_v16  ;;  %v4979_v15 = vld [vmem:[%s6548_s4 + $0xc0] sm:$0xff]  }
  0x31   :  { %670 = vmatprep.subr.bf16.mxu0 %v5344_v17  ;;  %783 = vmatprep.subr.bf16.mxu1 %v4913_v18  ;;  %v4980_v16 = vld [vmem:[%s6548_s4 + $0x80] sm:$0xff]   ;;  %v4983_v17 = vld [vmem:[%s6548_s4 + $0x1f8] sm:$0xff]  }
  0x32   :  { %377 = vmatmul.mubr.bf16.gmra.mxu0 %v4937_v35  ;;  %490 = vmatmul.mubr.bf16.gmra.mxu1 %v4937_v35  ;;  %v4985_v18 = vld [vmem:[%s6548_s4 + $0x178] sm:$0xff]  }
  0x33   :  { %386 = vmatprep.mubr.bf16.mxu0 %v5199_v1  ;;  %499 = vmatprep.mubr.bf16.mxu1 %v5199_v1 }
  0x34   :  { %671 = vmatpush1.bf16.msra.mxu0 %v5354_v19  ;;  %784 = vmatpush1.bf16.msra.mxu1 %v5359_v20  ;;  %v96_v19 = vlaneseq }
  0x35   :  { %672 = vmatprep.subr.bf16.mxu0 %v5366_v21  ;;  %785 = vmatprep.subr.bf16.mxu1 %v4919_v22 }
  0x36   :  { %v97_v20 = vshrl.u32 %v96_v19, 7 }
  0x38   :  { %673 = vmatpush1.bf16.msra.mxu0 %v5375_v23  ;;  %786 = vmatpush1.bf16.msra.mxu1 %v4922_v24  ;;  %v98_v21 = vsub.s32 0, %v97_v20  ;;  %v106_v22 = vsub.s32 2, %v97_v20  ;;  %v62_v23 = vld [vmem:[%s6549_s3] sm:$0xf]  ;;  %v102_v24 = vsub.s32 1, %v97_v20 }
  0x39   :  { %674 = vmatprep.subr.bf16.mxu0 %v4923_v25  ;;  %787 = vmatprep.subr.bf16.mxu1 %v4925_v26  ;;  %v110_v25 = vsub.s32 3, %v97_v20 }
  0x3a   :  { %387 = vmatmul.mubr.bf16.gmra.mxu0 %v4938_v36  ;;  %500 = vmatmul.mubr.bf16.gmra.mxu1 %v4938_v36  ;;  %v5612_v26 = vrot.slane %v62_v23, %v98_v21 }
  0x3b   :  { %396 = vmatprep.mubr.bf16.mxu0 %v5199_v1  ;;  %509 = vmatprep.mubr.bf16.mxu1 %v5199_v1 }
  0x3c   :  { %675 = vmatpush1.bf16.msra.mxu0 %v4927_v27  ;;  %788 = vmatpush1.bf16.msra.mxu1 %v4928_v28  ;;  %v5614_v27 = vrot.slane %v62_v23, %v106_v22  ;;  %v5616_v28 = vrot.slane %v62_v23, %v102_v24 }
  0x3d   :  { %676 = vmatprep.subr.bf16.mxu0 %v4929_v29  ;;  %789 = vmatprep.subr.bf16.mxu1 %v4931_v30  ;;  %v5618_v29 = vrot.slane %v62_v23, %v110_v25 }
  0x40   :  { %677 = vmatpush1.bf16.msra.mxu0 %v4933_v31  ;;  %790 = vmatpush1.bf16.msra.mxu1 %v4934_v32 }
  0x41   :  { %4525 = vmatprep.subr.bf16.mxu0 %v4951_v46  ;;  %4547 = vmatprep.subr.bf16.mxu1 %v4959_v54 }
  0x42   :  { %397 = vmatmul.mubr.bf16.gmra.mxu0 %v4939_v37  ;;  %510 = vmatmul.mubr.bf16.gmra.mxu1 %v4939_v37 }
  0x43   :  { %406 = vmatprep.mubr.bf16.mxu0 %v5199_v1  ;;  %519 = vmatprep.mubr.bf16.mxu1 %v5199_v1 }
  0x4a   :  { %407 = vmatmul.mubr.bf16.gmra.mxu0 %v4940_v38  ;;  %520 = vmatmul.mubr.bf16.gmra.mxu1 %v4940_v38 }
  0x4b   :  { %416 = vmatprep.mubr.bf16.mxu0 %v5199_v1  ;;  %529 = vmatprep.mubr.bf16.mxu1 %v5199_v1 }
  0x52   :  { %417 = vmatmul.mubr.bf16.gmra.mxu0 %v4941_v39  ;;  %530 = vmatmul.mubr.bf16.gmra.mxu1 %v4941_v39 }
  0x53   :  { %426 = vmatprep.mubr.bf16.mxu0 %v5199_v1  ;;  %539 = vmatprep.mubr.bf16.mxu1 %v5199_v1 }
  0x5a   :  { %427 = vmatmul.mubr.bf16.gmra.mxu0 %v4942_v40  ;;  %540 = vmatmul.mubr.bf16.gmra.mxu1 %v4942_v40 }
  0x5b   :  { %694 = vmatprep.mubr.bf16.mxu0 %v5199_v1  ;;  %807 = vmatprep.mubr.bf16.mxu1 %v5199_v1 }
  0x62   :  { %695 = vmatmul.mubr.bf16.vlgmr.msra.gmra.mxu0 %v4943_v41  ;;  %808 = vmatmul.mubr.bf16.vlgmr.msra.gmra.mxu1 %v4943_v41 }
  0x63   :  { %704 = vmatprep.mubr.bf16.mxu0 %v5199_v1  ;;  %817 = vmatprep.mubr.bf16.mxu1 %v5199_v1 }
  0x64   :  { %4526 = vmatpush3.bf16.msra.mxu0 %v4952_v47  ;;  %4548 = vmatpush3.bf16.msra.mxu1 %v4960_v57 }
  0x65   :  { %4527 = vmatprep.subr.bf16.mxu0 %v4953_v49  ;;  %4549 = vmatprep.subr.bf16.mxu1 %v4963_v59 }
  0x68   :  { %4528 = vmatpush3.bf16.msra.mxu0 %v4954_v50  ;;  %4550 = vmatpush3.bf16.msra.mxu1 %v4964_v60 }
  0x69   :  { %4529 = vmatprep.subr.bf16.mxu0 %v4955_v51  ;;  %4551 = vmatprep.subr.bf16.mxu1 %v4965_v61 }
  0x6a   :  { %705 = vmatmul.mubr.bf16.gmra.mxu0 %v4944_v42  ;;  %818 = vmatmul.mubr.bf16.gmra.mxu1 %v4944_v42 }
  0x6b   :  { %714 = vmatprep.mubr.bf16.mxu0 %v5199_v1  ;;  %827 = vmatprep.mubr.bf16.mxu1 %v5199_v1 }
  0x6c   :  { %4530 = vmatpush3.bf16.msra.mxu0 %v4956_v52  ;;  %4552 = vmatpush3.bf16.msra.mxu1 %v4966_v62 }
  0x6d   :  { %4531 = vmatprep.subr.bf16.mxu0 %v4957_v55 }
  0x70   :  { %4532 = vmatpush3.bf16.msra.mxu0 %v4958_v56 }
  0x71   :  { %4533 = vmatprep.subr.bf16.mxu0 %v4961_v63 }
  0x72   :  { %715 = vmatmul.mubr.bf16.gmra.mxu0 %v4945_v43  ;;  %828 = vmatmul.mubr.bf16.gmra.mxu1 %v4945_v43 }
  0x73   :  { %724 = vmatprep.mubr.bf16.mxu0 %v5199_v1  ;;  %837 = vmatprep.mubr.bf16.mxu1 %v5199_v1 }
  0x74   :  { %4534 = vmatpush3.bf16.msra.mxu0 %v4962_v0 }
  0x75   :  { %4535 = vmatprep.subr.bf16.mxu0 %v4967_v4 }
  0x78   :  { %4536 = vmatpush3.bf16.msra.mxu0 %v4968_v5 }
  0x79   :  { %4537 = vmatprep.subr.bf16.mxu0 %v4973_v11 }
  0x7a   :  { %725 = vmatmul.mubr.bf16.gmra.mxu0 %v4946_v44  ;;  %838 = vmatmul.mubr.bf16.gmra.mxu1 %v4946_v44 }
  0x7b   :  { %734 = vmatprep.mubr.bf16.mxu0 %v5199_v1  ;;  %847 = vmatprep.mubr.bf16.mxu1 %v5199_v1 }
  0x7c   :  { %4538 = vmatpush3.bf16.msra.mxu0 %v4974_v12 }
  0x7d   :  { %4539 = vmatprep.subr.bf16.mxu0 %v4979_v15 }
  0x80   :  { %4540 = vmatpush3.bf16.msra.mxu0 %v4980_v16 }
  0x81   :  { %4569 = vmatprep.subr.bf16.mxu0 %v4985_v18 }
  0x82   :  { %735 = vmatmul.mubr.bf16.gmra.mxu0 %v4947_v45  ;;  %848 = vmatmul.mubr.bf16.gmra.mxu1 %v4947_v45 }
  0x83   :  { %744 = vmatprep.mubr.bf16.mxu0 %v5199_v1  ;;  %857 = vmatprep.mubr.bf16.mxu1 %v5199_v1 }
  0x8a   :  { %745 = vmatmul.mubr.bf16.gmra.mxu0 %v4948_v48  ;;  %858 = vmatmul.mubr.bf16.gmra.mxu1 %v4948_v48 }
  0x8b   :  { %754 = vmatprep.mubr.bf16.mxu0 %v5199_v1  ;;  %867 = vmatprep.mubr.bf16.mxu1 %v5199_v1 }
  0x92   :  { %755 = vmatmul.mubr.bf16.gmra.mxu0 %v4949_v53  ;;  %868 = vmatmul.mubr.bf16.gmra.mxu1 %v4949_v53 }
  0x93   :  { %764 = vmatprep.mubr.bf16.mxu0 %v5199_v1  ;;  %877 = vmatprep.mubr.bf16.mxu1 %v5199_v1  ;;  %v4969_v1 = vld [vmem:[%s6548_s4 + $0x60] sm:$0xff]  }
  0x94   :  { %4553 = vmatprep.subr.bf16.mxu1 %v4969_v1 }
  0x95   :  { %4554 = vmatpush3.bf16.msra.mxu1 %v4970_v2 }
  0x96   :  { %4555 = vmatprep.subr.bf16.mxu1 %v4971_v3 }
  0x99   :  { %4556 = vmatpush3.bf16.msra.mxu1 %v4972_v6 }
  0x9a   :  { %765 = vmatmul.mubr.bf16.gmra.mxu0 %v4950_v58  ;;  %878 = vmatmul.mubr.bf16.gmra.mxu1 %v4950_v58 }
  0x9b   :  { %4557 = vmatprep.subr.bf16.mxu1 %v4975_v7 }
  0x9d   :  { %4558 = vmatpush3.bf16.msra.mxu1 %v4976_v8 }
  0x9e   :  { %4559 = vmatprep.subr.bf16.mxu1 %v4977_v9 }
  0xa1   :  { %4560 = vmatpush3.bf16.msra.mxu1 %v4978_v10 }
  0xa2   :  { %4561 = vmatprep.subr.bf16.mxu1 %v4981_v13 }
  0xa5   :  { %4562 = vmatpush3.bf16.msra.mxu1 %v4982_v14 }
  0xa6   :  { %4591 = vmatprep.subr.bf16.mxu1 %v4983_v17 }
  0xe2   :  { %v358_v30 = vpop.f32.mrf.mxu0  ;;  %v471_v31 = vpop.f32.mrf.mxu1 }
  0xe3   :  { %v359_v32 = vadd.f32 %v358_v30, %v5612_v26  ;;  %v472_v33 = vadd.f32 %v471_v31, %v5614_v27 }
  0xe4   :  { %v360_v34 = vpop.f32.mrf.mxu0  ;;  %v473_v35 = vpop.f32.mrf.mxu1 }
  0xe5   :  { %v550_v36 = vmax.f32 %v359_v32, 0.0  ;;  %v552_v37 = vmax.f32 %v472_v33, 0.0  ;;  %v361_v38 = vadd.f32 %v360_v34, %v5616_v28  ;;  %v474_v39 = vadd.f32 %v473_v35, %v5618_v29 }
  0xe6   :  { %v362_v40 = vpop.f32.mrf.mxu0  ;;  %v475_v41 = vpop.f32.mrf.mxu1 }
  0xe7   :  { %v5624_v42 = vmax.f32 %v550_v36, %v552_v37  ;;  %v551_v43 = vmax.f32 %v361_v38, 0.0  ;;  %v553_v44 = vmax.f32 %v474_v39, 0.0  ;;  %v363_v45 = vadd.f32 %v362_v40, %v5612_v26 }
  0xe8   :  { %v476_v46 = vadd.f32 %v475_v41, %v5614_v27  ;;  %v364_v47 = vpop.f32.mrf.mxu0  ;;  %v477_v48 = vpop.f32.mrf.mxu1 }
  0xe9   :  { %v5628_v49 = vmax.f32 %v551_v43, %v553_v44  ;;  %v554_v50 = vmax.f32 %v363_v45, 0.0  ;;  %v365_v51 = vadd.f32 %v364_v47, %v5616_v28  ;;  %v478_v52 = vadd.f32 %v477_v48, %v5618_v29 }
  0xea   :  { %v556_v53 = vmax.f32 %v476_v46, 0.0  ;;  %v368_v54 = vpop.f32.mrf.mxu0  ;;  %v481_v55 = vpop.f32.mrf.mxu1 }
  0xeb   :  { %v555_v56 = vmax.f32 %v365_v51, 0.0  ;;  %v557_v57 = vmax.f32 %v478_v52, 0.0  ;;  %v369_v58 = vadd.f32 %v368_v54, %v5612_v26  ;;  %v482_v59 = vadd.f32 %v481_v55, %v5614_v27 }
  0xec   :  { %v5634_v60 = vmax.f32 %v554_v50, %v556_v53  ;;  %v370_v61 = vpop.f32.mrf.mxu0  ;;  %v483_v62 = vpop.f32.mrf.mxu1 }
  0xed   :  { %v5636_v63 = vmax.f32 %v555_v56, %v557_v57  ;;  %v558_v0 = vmax.f32 %v369_v58, 0.0  ;;  %v560_v1 = vmax.f32 %v482_v59, 0.0  ;;  %v371_v2 = vadd.f32 %v370_v61, %v5616_v28 }
  0xee   :  { %v484_v3 = vadd.f32 %v483_v62, %v5618_v29  ;;  %v372_v4 = vpop.f32.mrf.mxu0  ;;  %v485_v5 = vpop.f32.mrf.mxu1 }
  0xef   :  { %v5640_v6 = vmax.f32 %v558_v0, %v560_v1  ;;  %v559_v7 = vmax.f32 %v371_v2, 0.0  ;;  %v373_v8 = vadd.f32 %v372_v4, %v5612_v26  ;;  %v486_v9 = vadd.f32 %v485_v5, %v5614_v27 }
  0xf0   :  { %v561_v10 = vmax.f32 %v484_v3, 0.0  ;;  %v374_v11 = vpop.f32.mrf.mxu0  ;;  %v487_v12 = vpop.f32.mrf.mxu1 }
  0xf1   :  { %v562_v13 = vmax.f32 %v373_v8, 0.0  ;;  %v564_v14 = vmax.f32 %v486_v9, 0.0  ;;  %v375_v15 = vadd.f32 %v374_v11, %v5616_v28  ;;  %v488_v16 = vadd.f32 %v487_v12, %v5618_v29 }
  0xf2   :  { %v5646_v17 = vmax.f32 %v559_v7, %v561_v10  ;;  %v378_v18 = vpop.f32.mrf.mxu0  ;;  %v491_v19 = vpop.f32.mrf.mxu1 }
  0xf3   :  { %v5648_v20 = vmax.f32 %v562_v13, %v564_v14  ;;  %v563_v21 = vmax.f32 %v375_v15, 0.0  ;;  %v565_v22 = vmax.f32 %v488_v16, 0.0  ;;  %v379_v23 = vadd.f32 %v378_v18, %v5612_v26 }
  0xf4   :  { %v492_v24 = vadd.f32 %v491_v19, %v5614_v27  ;;  %v380_v25 = vpop.f32.mrf.mxu0  ;;  %v493_v30 = vpop.f32.mrf.mxu1 }
  0xf5   :  { %v5652_v31 = vmax.f32 %v563_v21, %v565_v22  ;;  %v566_v32 = vmax.f32 %v379_v23, 0.0  ;;  %v381_v33 = vadd.f32 %v380_v25, %v5616_v28  ;;  %v494_v34 = vadd.f32 %v493_v30, %v5618_v29 }
  0xf6   :  { %v568_v35 = vmax.f32 %v492_v24, 0.0  ;;  %v382_v36 = vpop.f32.mrf.mxu0  ;;  %v495_v37 = vpop.f32.mrf.mxu1 }
  0xf7   :  { %v567_v38 = vmax.f32 %v381_v33, 0.0  ;;  %v569_v39 = vmax.f32 %v494_v34, 0.0  ;;  %v383_v40 = vadd.f32 %v382_v36, %v5612_v26  ;;  %v496_v41 = vadd.f32 %v495_v37, %v5614_v27 }
  0xf8   :  { %v5658_v43 = vmax.f32 %v566_v32, %v568_v35  ;;  %v384_v44 = vpop.f32.mrf.mxu0  ;;  %v497_v45 = vpop.f32.mrf.mxu1 }
  0xf9   :  { %v5660_v46 = vmax.f32 %v567_v38, %v569_v39  ;;  %v570_v47 = vmax.f32 %v383_v40, 0.0  ;;  %v572_v48 = vmax.f32 %v496_v41, 0.0  ;;  %v385_v50 = vadd.f32 %v384_v44, %v5616_v28 }
  0xfa   :  { %v498_v51 = vadd.f32 %v497_v45, %v5618_v29  ;;  %v388_v52 = vpop.f32.mrf.mxu0  ;;  %v501_v53 = vpop.f32.mrf.mxu1 }
  0xfb   :  { %v5664_v54 = vmax.f32 %v570_v47, %v572_v48  ;;  %v571_v55 = vmax.f32 %v385_v50, 0.0  ;;  %v389_v56 = vadd.f32 %v388_v52, %v5612_v26  ;;  %v502_v57 = vadd.f32 %v501_v53, %v5614_v27 }
  0xfc   :  { %v573_v58 = vmax.f32 %v498_v51, 0.0  ;;  %v390_v59 = vpop.f32.mrf.mxu0  ;;  %v503_v61 = vpop.f32.mrf.mxu1 }
  0xfd   :  { %v574_v62 = vmax.f32 %v389_v56, 0.0  ;;  %v576_v0 = vmax.f32 %v502_v57, 0.0  ;;  %v391_v1 = vadd.f32 %v390_v59, %v5616_v28  ;;  %v504_v2 = vadd.f32 %v503_v61, %v5618_v29 }
  0xfe   :  { %v5670_v3 = vmax.f32 %v571_v55, %v573_v58  ;;  %v392_v4 = vpop.f32.mrf.mxu0  ;;  %v505_v5 = vpop.f32.mrf.mxu1 }
  0xff   :  { %v5672_v7 = vmax.f32 %v574_v62, %v576_v0  ;;  %v575_v8 = vmax.f32 %v391_v1, 0.0  ;;  %v577_v9 = vmax.f32 %v504_v2, 0.0  ;;  %v393_v10 = vadd.f32 %v392_v4, %v5612_v26 }
 0x100   :  { %v506_v11 = vadd.f32 %v505_v5, %v5614_v27  ;;  %v394_v12 = vpop.f32.mrf.mxu0  ;;  %v507_v13 = vpop.f32.mrf.mxu1 }
 0x101   :  { %v5676_v14 = vmax.f32 %v575_v8, %v577_v9  ;;  %v578_v15 = vmax.f32 %v393_v10, 0.0  ;;  %v395_v16 = vadd.f32 %v394_v12, %v5616_v28  ;;  %v508_v18 = vadd.f32 %v507_v13, %v5618_v29 }
 0x102   :  { %v580_v19 = vmax.f32 %v506_v11, 0.0  ;;  %v398_v21 = vpop.f32.mrf.mxu0  ;;  %v511_v22 = vpop.f32.mrf.mxu1 }
 0x103   :  { %v579_v23 = vmax.f32 %v395_v16, 0.0  ;;  %v581_v24 = vmax.f32 %v508_v18, 0.0  ;;  %v399_v25 = vadd.f32 %v398_v21, %v5612_v26  ;;  %v512_v30 = vadd.f32 %v511_v22, %v5614_v27 }
 0x104   :  { %v5682_v32 = vmax.f32 %v578_v15, %v580_v19  ;;  %v400_v33 = vpop.f32.mrf.mxu0  ;;  %v513_v34 = vpop.f32.mrf.mxu1 }
 0x105   :  { %v5684_v35 = vmax.f32 %v579_v23, %v581_v24  ;;  %v582_v36 = vmax.f32 %v399_v25, 0.0  ;;  %v584_v37 = vmax.f32 %v512_v30, 0.0  ;;  %v401_v38 = vadd.f32 %v400_v33, %v5616_v28 }
 0x106   :  { %v514_v39 = vadd.f32 %v513_v34, %v5618_v29  ;;  %v402_v40 = vpop.f32.mrf.mxu0  ;;  %v515_v41 = vpop.f32.mrf.mxu1 }
 0x107   :  { %v5688_v44 = vmax.f32 %v582_v36, %v584_v37  ;;  %v583_v45 = vmax.f32 %v401_v38, 0.0  ;;  %v403_v47 = vadd.f32 %v402_v40, %v5612_v26  ;;  %v516_v48 = vadd.f32 %v515_v41, %v5614_v27 }
 0x108   :  { %v585_v50 = vmax.f32 %v514_v39, 0.0  ;;  %v404_v51 = vpop.f32.mrf.mxu0  ;;  %v517_v52 = vpop.f32.mrf.mxu1 }
 0x109   :  { %v586_v53 = vmax.f32 %v403_v47, 0.0  ;;  %v588_v55 = vmax.f32 %v516_v48, 0.0  ;;  %v405_v56 = vadd.f32 %v404_v51, %v5616_v28  ;;  %v518_v57 = vadd.f32 %v517_v52, %v5618_v29 }
 0x10a   :  { %v5694_v58 = vmax.f32 %v583_v45, %v585_v50  ;;  %v408_v59 = vpop.f32.mrf.mxu0  ;;  %v521_v61 = vpop.f32.mrf.mxu1 }
 0x10b   :  { %v5696_v62 = vmax.f32 %v586_v53, %v588_v55  ;;  %v587_v0 = vmax.f32 %v405_v56, 0.0  ;;  %v589_v1 = vmax.f32 %v518_v57, 0.0  ;;  %v409_v2 = vadd.f32 %v408_v59, %v5612_v26 }
 0x10c   :  { %v522_v4 = vadd.f32 %v521_v61, %v5614_v27  ;;  %v410_v5 = vpop.f32.mrf.mxu0  ;;  %v523_v8 = vpop.f32.mrf.mxu1 }
 0x10d   :  { %v5700_v9 = vmax.f32 %v587_v0, %v589_v1  ;;  %v590_v10 = vmax.f32 %v409_v2, 0.0  ;;  %v411_v11 = vadd.f32 %v410_v5, %v5616_v28  ;;  %v524_v12 = vadd.f32 %v523_v8, %v5618_v29 }
 0x10e   :  { %v592_v13 = vmax.f32 %v522_v4, 0.0  ;;  %v412_v15 = vpop.f32.mrf.mxu0  ;;  %v525_v16 = vpop.f32.mrf.mxu1 }
 0x10f   :  { %v591_v18 = vmax.f32 %v411_v11, 0.0  ;;  %v593_v19 = vmax.f32 %v524_v12, 0.0  ;;  %v413_v21 = vadd.f32 %v412_v15, %v5612_v26  ;;  %v526_v22 = vadd.f32 %v525_v16, %v5614_v27 }
 0x110   :  { %v5706_v23 = vmax.f32 %v590_v10, %v592_v13  ;;  %v414_v24 = vpop.f32.mrf.mxu0  ;;  %v527_v25 = vpop.f32.mrf.mxu1 }
 0x111   :  { %v5708_v30 = vmax.f32 %v591_v18, %v593_v19  ;;  %v594_v33 = vmax.f32 %v413_v21, 0.0  ;;  %v596_v34 = vmax.f32 %v526_v22, 0.0  ;;  %v415_v36 = vadd.f32 %v414_v24, %v5616_v28 }
 0x112   :  { %v528_v37 = vadd.f32 %v527_v25, %v5618_v29  ;;  %v418_v38 = vpop.f32.mrf.mxu0  ;;  %v531_v39 = vpop.f32.mrf.mxu1 }
 0x113   :  { %v5712_v40 = vmax.f32 %v594_v33, %v596_v34  ;;  %v595_v41 = vmax.f32 %v415_v36, 0.0  ;;  %v419_v45 = vadd.f32 %v418_v38, %v5612_v26  ;;  %v532_v47 = vadd.f32 %v531_v39, %v5614_v27 }
 0x114   :  { %v597_v48 = vmax.f32 %v528_v37, 0.0  ;;  %v420_v50 = vpop.f32.mrf.mxu0  ;;  %v533_v51 = vpop.f32.mrf.mxu1 }
 0x115   :  { %v598_v52 = vmax.f32 %v419_v45, 0.0  ;;  %v600_v53 = vmax.f32 %v532_v47, 0.0  ;;  %v421_v55 = vadd.f32 %v420_v50, %v5616_v28  ;;  %v534_v56 = vadd.f32 %v533_v51, %v5618_v29 }
 0x116   :  { %v5718_v57 = vmax.f32 %v595_v41, %v597_v48  ;;  %v422_v59 = vpop.f32.mrf.mxu0  ;;  %v535_v61 = vpop.f32.mrf.mxu1 }
 0x117   :  { %v5720_v0 = vmax.f32 %v598_v52, %v600_v53  ;;  %v599_v1 = vmax.f32 %v421_v55, 0.0  ;;  %v601_v2 = vmax.f32 %v534_v56, 0.0  ;;  %v423_v4 = vadd.f32 %v422_v59, %v5612_v26 }
 0x118   :  { %v536_v5 = vadd.f32 %v535_v61, %v5614_v27  ;;  %v424_v8 = vpop.f32.mrf.mxu0  ;;  %v537_v10 = vpop.f32.mrf.mxu1 }
 0x119   :  { %v5724_v11 = vmax.f32 %v599_v1, %v601_v2  ;;  %v602_v12 = vmax.f32 %v423_v4, 0.0  ;;  %v425_v13 = vadd.f32 %v424_v8, %v5616_v28  ;;  %v538_v15 = vadd.f32 %v537_v10, %v5618_v29 }
 0x11a   :  { %v604_v16 = vmax.f32 %v536_v5, 0.0  ;;  %v428_v18 = vpop.f32.mrf.mxu0  ;;  %v541_v19 = vpop.f32.mrf.mxu1 }
 0x11b   :  { %v603_v21 = vmax.f32 %v425_v13, 0.0  ;;  %v605_v22 = vmax.f32 %v538_v15, 0.0  ;;  %v429_v24 = vadd.f32 %v428_v18, %v5612_v26  ;;  %v542_v25 = vadd.f32 %v541_v19, %v5614_v27 }
 0x11c   :  { %v5730_v33 = vmax.f32 %v602_v12, %v604_v16  ;;  %v430_v34 = vpop.f32.mrf.mxu0  ;;  %v543_v36 = vpop.f32.mrf.mxu1 }
 0x11d   :  { %v5732_v37 = vmax.f32 %v603_v21, %v605_v22  ;;  %v606_v38 = vmax.f32 %v429_v24, 0.0  ;;  %v608_v39 = vmax.f32 %v542_v25, 0.0  ;;  %v431_v41 = vadd.f32 %v430_v34, %v5616_v28 }
 0x11e   :  { %v544_v45 = vadd.f32 %v543_v36, %v5618_v29  ;;  %v432_v47 = vpop.f32.mrf.mxu0  ;;  %v545_v48 = vpop.f32.mrf.mxu1 }
 0x11f   :  { %v5736_v50 = vmax.f32 %v606_v38, %v608_v39  ;;  %v607_v51 = vmax.f32 %v431_v41, 0.0  ;;  %v433_v52 = vadd.f32 %v432_v47, %v5612_v26  ;;  %v546_v53 = vadd.f32 %v545_v48, %v5614_v27 }
 0x120   :  { %v609_v55 = vmax.f32 %v544_v45, 0.0  ;;  %v434_v56 = vpop.f32.mrf.mxu0  ;;  %v547_v59 = vpop.f32.mrf.mxu1 }
 0x121   :  { %v610_v61 = vmax.f32 %v433_v52, 0.0  ;;  %v612_v1 = vmax.f32 %v546_v53, 0.0  ;;  %v435_v2 = vadd.f32 %v434_v56, %v5616_v28  ;;  %v548_v4 = vadd.f32 %v547_v59, %v5618_v29 }
 0x122   :  { %v5742_v5 = vmax.f32 %v607_v51, %v609_v55  ;;  %v696_v8 = vpop.f32.mrf.mxu0  ;;  %v809_v10 = vpop.f32.mrf.mxu1 }
 0x123   :  { %v5744_v12 = vmax.f32 %v610_v61, %v612_v1  ;;  %v611_v13 = vmax.f32 %v435_v2, 0.0  ;;  %v613_v15 = vmax.f32 %v548_v4, 0.0  ;;  %v697_v16 = vadd.f32 %v696_v8, %v5612_v26 }
 0x124   :  { %v810_v18 = vadd.f32 %v809_v10, %v5614_v27  ;;  %v698_v19 = vpop.f32.mrf.mxu0  ;;  %v811_v21 = vpop.f32.mrf.mxu1 }
 0x125   :  { %v5748_v22 = vmax.f32 %v611_v13, %v613_v15  ;;  %v888_v24 = vmax.f32 %v697_v16, 0.0  ;;  %v699_v25 = vadd.f32 %v698_v19, %v5616_v28  ;;  %v812_v34 = vadd.f32 %v811_v21, %v5618_v29 }
 0x126   :  { %v890_v36 = vmax.f32 %v810_v18, 0.0  ;;  %v700_v38 = vpop.f32.mrf.mxu0  ;;  %v813_v39 = vpop.f32.mrf.mxu1 }
 0x127   :  { %v701_v41 = vadd.f32 %v700_v38, %v5612_v26  ;;  %v814_v45 = vadd.f32 %v813_v39, %v5614_v27  ;;  %v889_v47 = vmax.f32 %v699_v25, 0.0  ;;  %v891_v48 = vmax.f32 %v812_v34, 0.0 }
 0x128   :  { %v702_v51 = vpop.f32.mrf.mxu0  ;;  %v815_v52 = vpop.f32.mrf.mxu1  ;;  %v984_v53 = vmax.f32 %v888_v24, %v890_v36 }
 0x129   :  { %v892_v55 = vmax.f32 %v701_v41, 0.0  ;;  %v894_v56 = vmax.f32 %v814_v45, 0.0  ;;  %v703_v59 = vadd.f32 %v702_v51, %v5616_v28  ;;  %v816_v61 = vadd.f32 %v815_v52, %v5618_v29 }
 0x12a   :  { %v706_v1 = vpop.f32.mrf.mxu0  ;;  %v819_v2 = vpop.f32.mrf.mxu1  ;;  %v985_v13 = vmax.f32 %v889_v47, %v891_v48  ;;  %v1016_v21 = vmax.f32 %v5624_v42, %v984_v53 }
 0x12b   :  { %v986_v4 = vmax.f32 %v892_v55, %v894_v56  ;;  %v893_v8 = vmax.f32 %v703_v59, 0.0  ;;  %v707_v10 = vadd.f32 %v706_v1, %v5612_v26  ;;  %v895_v15 = vmax.f32 %v816_v61, 0.0 }
 0x12c   :  { %v820_v16 = vadd.f32 %v819_v2, %v5614_v27  ;;  %v708_v18 = vpop.f32.mrf.mxu0  ;;  %v821_v19 = vpop.f32.mrf.mxu1  ;;  %v1017_v55 = vmax.f32 %v5628_v49, %v985_v13  ;;  %v4984_v49 = vld [vmem:[%s6548_s4 + $0x1b8] sm:$0xff]  }
 0x12d   :  { %v1018_v24 = vmax.f32 %v5634_v60, %v986_v4  ;;  %v709_v25 = vadd.f32 %v708_v18, %v5616_v28  ;;  %v822_v34 = vadd.f32 %v821_v19, %v5618_v29  ;;  %v987_v36 = vmax.f32 %v893_v8, %v895_v15  ;;  %v4987_v19 = vld [vmem:[%s6548_s4 + $0x1f0] sm:$0xff]  }
 0x12e   :  { %v896_v38 = vmax.f32 %v707_v10, 0.0  ;;  %v898_v39 = vmax.f32 %v820_v16, 0.0  ;;  %v710_v41 = vpop.f32.mrf.mxu0  ;;  %v823_v45 = vpop.f32.mrf.mxu1 }
 0x12f   :  { %v1048_v51 = vpack.c.bf16 %v1018_v24, %v1016_v21  ;;  %v897_v47 = vmax.f32 %v709_v25, 0.0  ;;  %v899_v48 = vmax.f32 %v822_v34, 0.0  ;;  %v711_v52 = vadd.f32 %v710_v41, %v5612_v26 }
 0x130   :  { %v1019_v42 = vmax.f32 %v5636_v63, %v987_v36  ;;  %v824_v60 = vadd.f32 %v823_v45, %v5614_v27  ;;  %v712_v53 = vpop.f32.mrf.mxu0  ;;  %v825_v56 = vpop.f32.mrf.mxu1  ;;  %v988_v1 = vmax.f32 %v896_v38, %v898_v39  ;;  %v4986_v39 = vld [vmem:[%s6548_s4 + $0x138] sm:$0xff]  }
 0x131   :  { %v900_v59 = vmax.f32 %v711_v52, 0.0  ;;  %v713_v61 = vadd.f32 %v712_v53, %v5616_v28  ;;  %v826_v4 = vadd.f32 %v825_v56, %v5618_v29  ;;  %v989_v13 = vmax.f32 %v897_v47, %v899_v48  ;;  %v4989_v52 = vld [vmem:[%s6548_s4 + $0x170] sm:$0xff]  }
 0x132   :  { %v902_v2 = vmax.f32 %v824_v60, 0.0  ;;  %v716_v8 = vpop.f32.mrf.mxu0  ;;  %v829_v10 = vpop.f32.mrf.mxu1  ;;  %v1049_v15 = vpack.c.bf16 %v1019_v42, %v1017_v55  ;;  %v1131_v21 = vrot.slane %v1048_v51, 4  ;;  %v1020_v55 = vmax.f32 %v5640_v6, %v988_v1  ;;  %v4991_v6 = vld [vmem:[%s6548_s4 + $0x1e8] sm:$0xff]  }
 0x133   :  { %v901_v63 = vmax.f32 %v713_v61, 0.0  ;;  %v717_v16 = vadd.f32 %v716_v8, %v5612_v26  ;;  %v830_v18 = vadd.f32 %v829_v10, %v5614_v27  ;;  %v903_v25 = vmax.f32 %v826_v4, 0.0 }
 0x134   :  { %v990_v24 = vmax.f32 %v900_v59, %v902_v2  ;;  %1399 = vmatprep.mubr.bf16.mxu1 %v1049_v15  ;;  %v718_v34 = vpop.f32.mrf.mxu0  ;;  %v831_v36 = vpop.f32.mrf.mxu1  ;;  %v1132_v38 = vrot.slane %v1049_v15, 4  ;;  %v4988_v59 = vld [vmem:[%s6548_s4 + $0x1b0] sm:$0xff]   ;;  %v1021_v61 = vmax.f32 %v5646_v17, %v989_v13 }
 0x135   :  { %v904_v41 = vmax.f32 %v717_v16, 0.0  ;;  %v906_v45 = vmax.f32 %v830_v18, 0.0  ;;  %v719_v47 = vadd.f32 %v718_v34, %v5616_v28  ;;  %v832_v48 = vadd.f32 %v831_v36, %v5618_v29  ;;  %1400 = vmatmul.mubr.bf16.vlgmr.msra.gmra.mxu1 %v1048_v51  ;;  %v4990_v17 = vld [vmem:[%s6548_s4 + $0x130] sm:$0xff]   ;;  %v4993_v16 = vld [vmem:[%s6548_s4 + $0x168] sm:$0xff]  }
 0x136   :  { %v1022_v42 = vmax.f32 %v5648_v20, %v990_v24  ;;  %v991_v60 = vmax.f32 %v901_v63, %v903_v25  ;;  %4592 = vmatpush3.bf16.msra.mxu1 %v4984_v49  ;;  %1263 = vmatprep.mubr.bf16.mxu0 %v1132_v38  ;;  %v720_v53 = vpop.f32.mrf.mxu0  ;;  %v833_v56 = vpop.f32.mrf.mxu1  ;;  %v4992_v25 = vld [vmem:[%s6548_s4 + $0x1a8] sm:$0xff]  }
 0x137   :  { %v905_v51 = vmax.f32 %v719_v47, 0.0  ;;  %v721_v2 = vadd.f32 %v720_v53, %v5612_v26  ;;  %1264 = vmatmul.mubr.bf16.vlgmr.msra.gmra.mxu0 %v1131_v21  ;;  %4593 = vmatprep.subr.bf16.mxu1 %v4987_v19  ;;  %v907_v4 = vmax.f32 %v832_v48, 0.0  ;;  %v834_v8 = vadd.f32 %v833_v56, %v5614_v27 }
 0x138   :  { %v5794_v20 = vpack.c.bf16 %v1022_v42, %v1020_v55  ;;  %v1023_v1 = vmax.f32 %v5652_v31, %v991_v60  ;;  %4570 = vmatpush3.bf16.msra.mxu0 %v4986_v39  ;;  %v722_v10 = vpop.f32.mrf.mxu0  ;;  %v835_v15 = vpop.f32.mrf.mxu1  ;;  %v992_v49 = vmax.f32 %v904_v41, %v906_v45  ;;  %v4995_v39 = vld [vmem:[%s6548_s4 + $0x1e0] sm:$0xff]   ;;  %v4994_v42 = vld [vmem:[%s6548_s4 + $0x128] sm:$0xff]  }
 0x139   :  { %v908_v13 = vmax.f32 %v721_v2, 0.0  ;;  %v723_v63 = vadd.f32 %v722_v10, %v5616_v28  ;;  %4571 = vmatprep.subr.bf16.mxu0 %v4989_v52  ;;  %v910_v31 = vmax.f32 %v834_v8, 0.0  ;;  %v836_v18 = vadd.f32 %v835_v15, %v5618_v29 }
 0x13a   :  { %4594 = vmatpush3.bf16.msra.mxu1 %v4988_v59  ;;  %v726_v19 = vpop.f32.mrf.mxu0  ;;  %v839_v21 = vpop.f32.mrf.mxu1  ;;  %v1051_v24 = vpack.c.bf16 %v1023_v1, %v1021_v61  ;;  %v993_v41 = vmax.f32 %v905_v51, %v907_v4  ;;  %v1024_v60 = vmax.f32 %v5658_v43, %v992_v49  ;;  %v4996_v59 = vld [vmem:[%s6548_s4 + $0x1a0] sm:$0xff]  }
 0x13b   :  { %v909_v34 = vmax.f32 %v723_v63, 0.0  ;;  %v727_v36 = vadd.f32 %v726_v19, %v5612_v26  ;;  %v840_v38 = vadd.f32 %v839_v21, %v5614_v27  ;;  %4595 = vmatprep.subr.bf16.mxu1 %v4991_v6  ;;  %v994_v45 = vmax.f32 %v908_v13, %v910_v31  ;;  %v4997_v61 = vld [vmem:[%s6548_s4 + $0x160] sm:$0xff]  }
 0x13c   :  { %v911_v47 = vmax.f32 %v836_v18, 0.0  ;;  %4572 = vmatpush3.bf16.msra.mxu0 %v4990_v17  ;;  %1568 = vmatprep.mubr.bf16.mxu0 %v1051_v24  ;;  %v728_v48 = vpop.f32.mrf.mxu0  ;;  %v841_v52 = vpop.f32.mrf.mxu1  ;;  %v1613_v55 = vrot.slane %v1051_v24, 4  ;;  %v4999_v17 = vld [vmem:[%s6548_s4 + $0x1d8] sm:$0xff]   ;;  %v1025_v49 = vmax.f32 %v5660_v46, %v993_v41  ;;  %v4998_v18 = vld [vmem:[%s6548_s4 + $0x120] sm:$0xff]  }
 0x13d   :  { %v729_v53 = vadd.f32 %v728_v48, %v5616_v28  ;;  %v842_v56 = vadd.f32 %v841_v52, %v5618_v29  ;;  %4573 = vmatprep.subr.bf16.mxu0 %v4993_v16  ;;  %v1026_v51 = vmax.f32 %v5664_v54, %v994_v45  ;;  %v912_v6 = vmax.f32 %v727_v36, 0.0  ;;  %v5001_v46 = vld [vmem:[%s6548_s4 + $0x158] sm:$0xff]   ;;  %v5003_v52 = vld [vmem:[%s6548_s4 + $0x1d0] sm:$0xff]  }
 0x13e   :  { %v995_v2 = vmax.f32 %v909_v34, %v911_v47  ;;  %v914_v1 = vmax.f32 %v840_v38, 0.0  ;;  %4596 = vmatpush3.bf16.msra.mxu1 %v4992_v25  ;;  %1744 = vmatprep.mubr.bf16.mxu1 %v1613_v55  ;;  %v730_v43 = vpop.f32.mrf.mxu0  ;;  %v843_v4 = vpop.f32.mrf.mxu1  ;;  %v5000_v38 = vld [vmem:[%s6548_s4 + $0x198] sm:$0xff]  }
 0x13f   :  { %v913_v8 = vmax.f32 %v729_v53, 0.0  ;;  %v915_v10 = vmax.f32 %v842_v56, 0.0  ;;  %v731_v15 = vadd.f32 %v730_v43, %v5612_v26  ;;  %4597 = vmatprep.subr.bf16.mxu1 %v4995_v39  ;;  %v5832_v13 = vpack.c.bf16 %v1026_v51, %v1024_v60  ;;  %v5002_v56 = vld [vmem:[%s6548_s4 + $0x118] sm:$0xff]  }
 0x140   :  { %v1027_v54 = vmax.f32 %v5670_v3, %v995_v2  ;;  %v844_v63 = vadd.f32 %v843_v4, %v5614_v27  ;;  %4574 = vmatpush3.bf16.msra.mxu0 %v4994_v42  ;;  %v732_v16 = vpop.f32.mrf.mxu0  ;;  %v845_v31 = vpop.f32.mrf.mxu1  ;;  %v996_v24 = vmax.f32 %v912_v6, %v914_v1  ;;  %v5005_v6 = vld [vmem:[%s6548_s4 + $0x150] sm:$0xff]  }
 0x141   :  { %v916_v19 = vmax.f32 %v731_v15, 0.0  ;;  %v733_v21 = vadd.f32 %v732_v16, %v5616_v28  ;;  %4575 = vmatprep.subr.bf16.mxu0 %v4997_v61  ;;  %v846_v3 = vadd.f32 %v845_v31, %v5618_v29  ;;  %v997_v41 = vmax.f32 %v913_v8, %v915_v10  ;;  %v5004_v15 = vld [vmem:[%s6548_s4 + $0x190] sm:$0xff]  }
 0x142   :  { %v918_v25 = vmax.f32 %v844_v63, 0.0  ;;  %4598 = vmatpush3.bf16.msra.mxu1 %v4996_v59  ;;  %v736_v34 = vpop.f32.mrf.mxu0  ;;  %v849_v36 = vpop.f32.mrf.mxu1  ;;  %v5847_v39 = vpack.c.bf16 %v1027_v54, %v1025_v49  ;;  %v1028_v1 = vmax.f32 %v5672_v7, %v996_v24  ;;  %v5007_v7 = vld [vmem:[%s6548_s4 + $0x1c8] sm:$0xff]  }
 0x143   :  { %v917_v45 = vmax.f32 %v733_v21, 0.0  ;;  %v737_v47 = vadd.f32 %v736_v34, %v5612_v26  ;;  %v850_v48 = vadd.f32 %v849_v36, %v5614_v27  ;;  %4599 = vmatprep.subr.bf16.mxu1 %v4999_v17  ;;  %v919_v42 = vmax.f32 %v846_v3, 0.0 }
 0x144   :  { %v998_v55 = vmax.f32 %v916_v19, %v918_v25  ;;  %4576 = vmatpush3.bf16.msra.mxu0 %v4998_v18  ;;  %v738_v60 = vpop.f32.mrf.mxu0  ;;  %v851_v53 = vpop.f32.mrf.mxu1  ;;  %v1029_v17 = vmax.f32 %v5676_v14, %v997_v41  ;;  %v5006_v14 = vld [vmem:[%s6548_s4 + $0x110] sm:$0xff]   ;;  %v5009_v25 = vld [vmem:[%s6548_s4 + $0x148] sm:$0xff]  }
 0x145   :  { %v920_v59 = vmax.f32 %v737_v47, 0.0  ;;  %v922_v61 = vmax.f32 %v850_v48, 0.0  ;;  %v739_v51 = vadd.f32 %v738_v60, %v5616_v28  ;;  %v852_v2 = vadd.f32 %v851_v53, %v5618_v29  ;;  %4577 = vmatprep.subr.bf16.mxu0 %v5001_v46 }
 0x146   :  { %v1030_v43 = vmax.f32 %v5682_v32, %v998_v55  ;;  %v999_v4 = vmax.f32 %v917_v45, %v919_v42  ;;  %4600 = vmatpush3.bf16.msra.mxu1 %v5000_v38  ;;  %v740_v8 = vpop.f32.mrf.mxu0  ;;  %v853_v10 = vpop.f32.mrf.mxu1  ;;  %v5008_v38 = vld [vmem:[%s6548_s4 + $0x188] sm:$0xff]  }
 0x147   :  { %v921_v49 = vmax.f32 %v739_v51, 0.0  ;;  %v741_v54 = vadd.f32 %v740_v8, %v5612_v26  ;;  %4601 = vmatprep.subr.bf16.mxu1 %v5003_v52  ;;  %v923_v16 = vmax.f32 %v852_v2, 0.0  ;;  %v854_v31 = vadd.f32 %v853_v10, %v5614_v27  ;;  %v5011_v52 = vld [vmem:[%s6548_s4 + $0x1c0] sm:$0xff]  }
 0x148   :  { %v5872_v63 = vpack.c.bf16 %v1030_v43, %v1028_v1  ;;  %v1031_v32 = vmax.f32 %v5684_v35, %v999_v4  ;;  %4578 = vmatpush3.bf16.msra.mxu0 %v5002_v56  ;;  %v742_v18 = vpop.f32.mrf.mxu0  ;;  %v855_v19 = vpop.f32.mrf.mxu1  ;;  %v1000_v21 = vmax.f32 %v920_v59, %v922_v61  ;;  %v5010_v59 = vld [vmem:[%s6548_s4 + $0x108] sm:$0xff]   ;;  %v5013_v1 = vld [vmem:[%s6548_s4 + $0x140] sm:$0xff]  }
 0x149   :  { %v924_v46 = vmax.f32 %v741_v54, 0.0  ;;  %v743_v24 = vadd.f32 %v742_v18, %v5616_v28  ;;  %4579 = vmatprep.subr.bf16.mxu0 %v5005_v6  ;;  %v926_v35 = vmax.f32 %v854_v31, 0.0  ;;  %v856_v3 = vadd.f32 %v855_v19, %v5618_v29  ;;  %v5012_v6 = vld [vmem:[%s6548_s4 + $0x180] sm:$0xff]  }
 0x14a   :  { %4602 = vmatpush3.bf16.msra.mxu1 %v5004_v15  ;;  %v746_v34 = vpop.f32.mrf.mxu0  ;;  %v859_v36 = vpop.f32.mrf.mxu1  ;;  %v5887_v41 = vpack.c.bf16 %v1031_v32, %v1029_v17  ;;  %v1001_v55 = vmax.f32 %v921_v49, %v923_v16  ;;  %v1032_v61 = vmax.f32 %v5688_v44, %v1000_v21  ;;  %v5015_v32 = vld [vmem:[%s6548_s4 + $0x2f8] sm:$0xff]  }
 0x14b   :  { %v925_v45 = vmax.f32 %v743_v24, 0.0  ;;  %v747_v47 = vadd.f32 %v746_v34, %v5612_v26  ;;  %v860_v48 = vadd.f32 %v859_v36, %v5614_v27  ;;  %4603 = vmatprep.subr.bf16.mxu1 %v5007_v7  ;;  %v1002_v42 = vmax.f32 %v924_v46, %v926_v35  ;;  %v5014_v7 = vld [vmem:[%s6548_s4 + $0x100] sm:$0xff]   ;;  %v5017_v21 = vld [vmem:[%s6548_s4 + $0x278] sm:$0xff]  }
 0x14c   :  { %v927_v60 = vmax.f32 %v856_v3, 0.0  ;;  %4580 = vmatpush3.bf16.msra.mxu0 %v5006_v14  ;;  %v748_v53 = vpop.f32.mrf.mxu0  ;;  %v861_v56 = vpop.f32.mrf.mxu1  ;;  %v5016_v36 = vld [vmem:[%s6548_s4 + $0x2b8] sm:$0xff]  }
 0x14d   :  { %v749_v51 = vadd.f32 %v748_v53, %v5616_v28  ;;  %v862_v2 = vadd.f32 %v861_v56, %v5618_v29  ;;  %4581 = vmatprep.subr.bf16.mxu0 %v5009_v25  ;;  %v1034_v43 = vmax.f32 %v5696_v62, %v1002_v42  ;;  %v928_v8 = vmax.f32 %v747_v47, 0.0 }
 0x14e   :  { %v1003_v4 = vmax.f32 %v925_v45, %v927_v60  ;;  %v930_v10 = vmax.f32 %v860_v48, 0.0  ;;  %4604 = vmatpush3.bf16.msra.mxu1 %v5008_v38  ;;  %v750_v44 = vpop.f32.mrf.mxu0  ;;  %v863_v15 = vpop.f32.mrf.mxu1  ;;  %v1033_v62 = vmax.f32 %v5694_v58, %v1001_v55  ;;  %v1612_v25 = vrot.slane %v5794_v20, 4  ;;  %v5019_v55 = vld [vmem:[%s6548_s4 + $0x2f0] sm:$0xff]  }
 0x14f   :  { %v929_v17 = vmax.f32 %v749_v51, 0.0  ;;  %v931_v49 = vmax.f32 %v862_v2, 0.0  ;;  %v751_v54 = vadd.f32 %v750_v44, %v5612_v26  ;;  %4605 = vmatprep.subr.bf16.mxu1 %v5011_v52  ;;  %v5915_v16 = vpack.c.bf16 %v1034_v43, %v1032_v61  ;;  %v5018_v61 = vld [vmem:[%s6548_s4 + $0x238] sm:$0xff]   ;;  %v5021_v43 = vld [vmem:[%s6548_s4 + $0x270] sm:$0xff]  }
 0x150   :  { %v1035_v31 = vmax.f32 %v5700_v9, %v1003_v4  ;;  %v864_v18 = vadd.f32 %v863_v15, %v5614_v27  ;;  %4582 = vmatpush3.bf16.msra.mxu0 %v5010_v59  ;;  %v752_v19 = vpop.f32.mrf.mxu0  ;;  %v865_v14 = vpop.f32.mrf.mxu1  ;;  %v1004_v58 = vmax.f32 %v928_v8, %v930_v10  ;;  %v1959_v59 = vrot.slane %v5847_v39, 4 }
 0x151   :  { %v932_v46 = vmax.f32 %v751_v54, 0.0  ;;  %v753_v24 = vadd.f32 %v752_v19, %v5616_v28  ;;  %4583 = vmatprep.subr.bf16.mxu0 %v5013_v1  ;;  %v866_v3 = vadd.f32 %v865_v14, %v5618_v29  ;;  %v1005_v45 = vmax.f32 %v929_v17, %v931_v49  ;;  %v5020_v17 = vld [vmem:[%s6548_s4 + $0x2b0] sm:$0xff]  }
 0x152   :  { %v934_v35 = vmax.f32 %v864_v18, 0.0  ;;  %4606 = vmatpush3.bf16.msra.mxu1 %v5012_v6  ;;  %v756_v9 = vpop.f32.mrf.mxu0  ;;  %v869_v34 = vpop.f32.mrf.mxu1  ;;  %v5928_v38 = vpack.c.bf16 %v1035_v31, %v1033_v62  ;;  %v1036_v4 = vmax.f32 %v5706_v23, %v1004_v58  ;;  %v5023_v23 = vld [vmem:[%s6548_s4 + $0x2e8] sm:$0xff]  }
 0x153   :  { %v933_v47 = vmax.f32 %v753_v24, 0.0  ;;  %v757_v48 = vadd.f32 %v756_v9, %v5612_v26  ;;  %v870_v52 = vadd.f32 %v869_v34, %v5614_v27  ;;  %4635 = vmatprep.subr.bf16.mxu1 %v5015_v32  ;;  %v935_v60 = vmax.f32 %v866_v3, 0.0  ;;  %v5024_v58 = vld [vmem:[%s6548_s4 + $0x2a8] sm:$0xff]  }
 0x154   :  { %v1006_v42 = vmax.f32 %v932_v46, %v934_v35  ;;  %4584 = vmatpush3.bf16.msra.mxu0 %v5014_v7  ;;  %v758_v53 = vpop.f32.mrf.mxu0  ;;  %v871_v56 = vpop.f32.mrf.mxu1  ;;  %v1037_v49 = vmax.f32 %v5708_v30, %v1005_v45  ;;  %v5027_v45 = vld [vmem:[%s6548_s4 + $0x2e0] sm:$0xff]  }
 0x155   :  { %v936_v51 = vmax.f32 %v757_v48, 0.0  ;;  %v938_v2 = vmax.f32 %v870_v52, 0.0  ;;  %1745 = vmatmul.mubr.bf16.vlgmr.msra.gmra.mxu1 %v1612_v25  ;;  %v759_v6 = vadd.f32 %v758_v53, %v5616_v28  ;;  %v872_v1 = vadd.f32 %v871_v56, %v5618_v29  ;;  %4613 = vmatprep.subr.bf16.mxu0 %v5017_v21 }
 0x156   :  { %v1038_v8 = vmax.f32 %v5712_v40, %v1006_v42  ;;  %v1007_v10 = vmax.f32 %v933_v47, %v935_v60  ;;  %4636 = vmatpush3.bf16.msra.mxu1 %v5016_v36  ;;  %2090 = vmatprep.mubr.bf16.mxu1 %v1959_v59  ;;  %v760_v44 = vpop.f32.mrf.mxu0  ;;  %v873_v15 = vpop.f32.mrf.mxu1  ;;  %v5026_v42 = vld [vmem:[%s6548_s4 + $0x228] sm:$0xff]   ;;  %v5028_v59 = vld [vmem:[%s6548_s4 + $0x2a0] sm:$0xff]  }
 0x157   :  { %v937_v54 = vmax.f32 %v759_v6, 0.0  ;;  %v939_v7 = vmax.f32 %v872_v1, 0.0  ;;  %1569 = vmatmul.mubr.bf16.vlgmr.msra.gmra.mxu0 %v5794_v20  ;;  %v761_v32 = vadd.f32 %v760_v44, %v5612_v26  ;;  %4637 = vmatprep.subr.bf16.mxu1 %v5019_v55  ;;  %v874_v31 = vadd.f32 %v873_v15, %v5614_v27  ;;  %v5022_v20 = vld [vmem:[%s6548_s4 + $0x230] sm:$0xff]   ;;  %v5031_v44 = vld [vmem:[%s6548_s4 + $0x2d8] sm:$0xff]  }
 0x158   :  { %v5955_v40 = vpack.c.bf16 %v1038_v8, %v1036_v4  ;;  %v1039_v62 = vmax.f32 %v5718_v57, %v1007_v10  ;;  %4614 = vmatpush3.bf16.msra.mxu0 %v5018_v61  ;;  %1914 = vmatprep.mubr.bf16.mxu0 %v5847_v39  ;;  %v762_v30 = vpop.f32.mrf.mxu0  ;;  %v875_v18 = vpop.f32.mrf.mxu1  ;;  %v1008_v19 = vmax.f32 %v936_v51, %v938_v2  ;;  %v5025_v57 = vld [vmem:[%s6548_s4 + $0x268] sm:$0xff]   ;;  %v5029_v61 = vld [vmem:[%s6548_s4 + $0x260] sm:$0xff]  }
 0x159   :  { %v940_v14 = vmax.f32 %v761_v32, 0.0  ;;  %v763_v21 = vadd.f32 %v762_v30, %v5616_v28  ;;  %4615 = vmatprep.subr.bf16.mxu0 %v5021_v43  ;;  %v942_v46 = vmax.f32 %v874_v31, 0.0  ;;  %v876_v24 = vadd.f32 %v875_v18, %v5618_v29 }
 0x15a   :  { %4638 = vmatpush3.bf16.msra.mxu1 %v5020_v17  ;;  %v766_v39 = vpop.f32.mrf.mxu0  ;;  %v879_v25 = vpop.f32.mrf.mxu1  ;;  %v5971_v35 = vpack.c.bf16 %v1039_v62, %v1037_v49  ;;  %v1009_v3 = vmax.f32 %v937_v54, %v939_v7  ;;  %v1040_v60 = vmax.f32 %v5720_v0, %v1008_v19 }
 0x15b   :  { %v941_v9 = vmax.f32 %v763_v21, 0.0  ;;  %v767_v34 = vadd.f32 %v766_v39, %v5612_v26  ;;  %v880_v36 = vadd.f32 %v879_v25, %v5614_v27  ;;  %4639 = vmatprep.subr.bf16.mxu1 %v5023_v23  ;;  %v1010_v47 = vmax.f32 %v940_v14, %v942_v46  ;;  %v5033_v23 = vld [vmem:[%s6548_s4 + $0x258] sm:$0xff]   ;;  %v5036_v21 = vld [vmem:[%s6548_s4 + $0x290] sm:$0xff]  }
 0x15c   :  { %v943_v48 = vmax.f32 %v876_v24, 0.0  ;;  %4616 = vmatpush3.bf16.msra.mxu0 %v5022_v20  ;;  %v768_v52 = vpop.f32.mrf.mxu0  ;;  %v881_v55 = vpop.f32.mrf.mxu1  ;;  %v1041_v4 = vmax.f32 %v5724_v11, %v1009_v3  ;;  %v5030_v11 = vld [vmem:[%s6548_s4 + $0x220] sm:$0xff]   ;;  %v5038_v25 = vld [vmem:[%s6548_s4 + $0x210] sm:$0xff]  }
 0x15d   :  { %v769_v53 = vadd.f32 %v768_v52, %v5616_v28  ;;  %v882_v56 = vadd.f32 %v881_v55, %v5618_v29  ;;  %4617 = vmatprep.subr.bf16.mxu0 %v5025_v57  ;;  %v1042_v51 = vmax.f32 %v5730_v33, %v1010_v47  ;;  %v944_v6 = vmax.f32 %v767_v34, 0.0  ;;  %v5037_v57 = vld [vmem:[%s6548_s4 + $0x250] sm:$0xff]   ;;  %v5045_v47 = vld [vmem:[%s6548_s4 + $0x240] sm:$0xff]   ;;  %v5047_v52 = vld [vmem:[%s6548_s4 + $0x3f8] sm:$0xff]  }
 0x15e   :  { %v1011_v2 = vmax.f32 %v941_v9, %v943_v48  ;;  %v946_v1 = vmax.f32 %v880_v36, 0.0  ;;  %4640 = vmatpush3.bf16.msra.mxu1 %v5024_v58  ;;  %v770_v0 = vpop.f32.mrf.mxu0  ;;  %v883_v43 = vpop.f32.mrf.mxu1  ;;  %v5039_v58 = vld [vmem:[%s6548_s4 + $0x2c8] sm:$0xff]   ;;  %v5046_v48 = vld [vmem:[%s6548_s4 + $0x200] sm:$0xff]   ;;  %v5048_v55 = vld [vmem:[%s6548_s4 + $0x3b8] sm:$0xff]  }
 0x15f   :  { %v945_v8 = vmax.f32 %v769_v53, 0.0  ;;  %v771_v10 = vadd.f32 %v770_v0, %v5612_v26  ;;  %4641 = vmatprep.subr.bf16.mxu1 %v5027_v45  ;;  %v5996_v15 = vpack.c.bf16 %v1042_v51, %v1040_v60  ;;  %v947_v17 = vmax.f32 %v882_v56, 0.0  ;;  %v5042_v36 = vld [vmem:[%s6548_s4 + $0x208] sm:$0xff]   ;;  %v5044_v45 = vld [vmem:[%s6548_s4 + $0x280] sm:$0xff]   ;;  %v5051_v60 = vld [vmem:[%s6548_s4 + $0x3f0] sm:$0xff]  }
 0x160   :  { %v1043_v33 = vmax.f32 %v5732_v37, %v1011_v2  ;;  %v884_v49 = vadd.f32 %v883_v43, %v5614_v27  ;;  %4618 = vmatpush3.bf16.msra.mxu0 %v5026_v42  ;;  %v772_v54 = vpop.f32.mrf.mxu0  ;;  %v885_v7 = vpop.f32.mrf.mxu1  ;;  %v1012_v62 = vmax.f32 %v944_v6, %v946_v1  ;;  %v5032_v27 = vld [vmem:[%s6548_s4 + $0x298] sm:$0xff]   ;;  %v1958_v53 = vrot.slane %v5832_v13, 4  ;;  %v5052_v51 = vld [vmem:[%s6548_s4 + $0x3b0] sm:$0xff]   ;;  %v5055_v2 = vld [vmem:[%s6548_s4 + $0x3e8] sm:$0xff]  }
 0x161   :  { %v948_v26 = vmax.f32 %v771_v10, 0.0  ;;  %v773_v32 = vadd.f32 %v772_v54, %v5616_v28  ;;  %4619 = vmatprep.subr.bf16.mxu0 %v5029_v61  ;;  %v886_v31 = vadd.f32 %v885_v7, %v5618_v29  ;;  %v5035_v28 = vld [vmem:[%s6548_s4 + $0x2d0] sm:$0xff]   ;;  %v1013_v20 = vmax.f32 %v945_v8, %v947_v17  ;;  %v5034_v29 = vld [vmem:[%s6548_s4 + $0x218] sm:$0xff]   ;;  %v5057_v1 = vld [vmem:[%s6548_s4 + $0x368] sm:$0xff]  }
 0x162   :  { %v950_v37 = vmax.f32 %v884_v49, 0.0  ;;  %4642 = vmatpush3.bf16.msra.mxu1 %v5028_v59  ;;  %v6011_v30 = vpack.c.bf16 %v1043_v33, %v1041_v4  ;;  %v1044_v46 = vmax.f32 %v5736_v50, %v1012_v62  ;;  %v5040_v50 = vld [vmem:[%s6548_s4 + $0x288] sm:$0xff]   ;;  %v5049_v42 = vld [vmem:[%s6548_s4 + $0x378] sm:$0xff]   ;;  %v2305_v56 = vrot.slane %v5887_v41, 4  ;;  %v5053_v61 = vld [vmem:[%s6548_s4 + $0x370] sm:$0xff]  }
 0x163   :  { %v949_v18 = vmax.f32 %v773_v32, 0.0  ;;  %4643 = vmatprep.subr.bf16.mxu1 %v5031_v44  ;;  %v951_v14 = vmax.f32 %v886_v31, 0.0  ;;  %v1045_v3 = vmax.f32 %v5742_v5, %v1013_v20  ;;  %v5050_v59 = vld [vmem:[%s6548_s4 + $0x338] sm:$0xff]   ;;  %v5054_v6 = vld [vmem:[%s6548_s4 + $0x330] sm:$0xff]   ;;  %v5059_v0 = vld [vmem:[%s6548_s4 + $0x3e0] sm:$0xff]  }
 0x164   :  { %v1014_v19 = vmax.f32 %v948_v26, %v950_v37  ;;  %4620 = vmatpush3.bf16.msra.mxu0 %v5030_v11  ;;  %v5061_v43 = vld [vmem:[%s6548_s4 + $0x360] sm:$0xff]   ;;  %v5063_v8 = vld [vmem:[%s6548_s4 + $0x3d8] sm:$0xff]   ;;  %v5067_v17 = vld [vmem:[%s6548_s4 + $0x3d0] sm:$0xff]  }
 0x165   :  { %4621 = vmatprep.subr.bf16.mxu0 %v5033_v23  ;;  %v1015_v39 = vmax.f32 %v949_v18, %v951_v14  ;;  %v5060_v4 = vld [vmem:[%s6548_s4 + $0x3a0] sm:$0xff]   ;;  %v5065_v44 = vld [vmem:[%s6548_s4 + $0x358] sm:$0xff]   ;;  %v5069_v54 = vld [vmem:[%s6548_s4 + $0x350] sm:$0xff]   ;;  %v2304_v14 = vrot.slane %v5872_v63, 4 }
 0x166   :  { %v1046_v24 = vmax.f32 %v5744_v12, %v1014_v19  ;;  %4644 = vmatpush3.bf16.msra.mxu1 %v5032_v27  ;;  %v5041_v12 = vld [vmem:[%s6548_s4 + $0x248] sm:$0xff]   ;;  %v5062_v10 = vld [vmem:[%s6548_s4 + $0x320] sm:$0xff]   ;;  %v5064_v33 = vld [vmem:[%s6548_s4 + $0x398] sm:$0xff]  }
 0x167   :  { %4645 = vmatprep.subr.bf16.mxu1 %v5035_v28  ;;  %v1047_v34 = vmax.f32 %v5748_v22, %v1015_v39  ;;  %v5043_v22 = vld [vmem:[%s6548_s4 + $0x2c0] sm:$0xff]   ;;  %v5066_v49 = vld [vmem:[%s6548_s4 + $0x318] sm:$0xff]   ;;  %v5068_v7 = vld [vmem:[%s6548_s4 + $0x390] sm:$0xff]  }
 0x168   :  { %v6034_v9 = vpack.c.bf16 %v1046_v24, %v1044_v46  ;;  %4622 = vmatpush3.bf16.msra.mxu0 %v5034_v29  ;;  %v5071_v11 = vld [vmem:[%s6548_s4 + $0x3c8] sm:$0xff]   ;;  %v5070_v26 = vld [vmem:[%s6548_s4 + $0x310] sm:$0xff]   ;;  %v5075_v62 = vld [vmem:[%s6548_s4 + $0x3c0] sm:$0xff]  }
 0x169   :  { %4623 = vmatprep.subr.bf16.mxu0 %v5037_v57  ;;  %v6046_v5 = vpack.c.bf16 %v1047_v34, %v1045_v3  ;;  %v5073_v32 = vld [vmem:[%s6548_s4 + $0x348] sm:$0xff]   ;;  %v5077_v31 = vld [vmem:[%s6548_s4 + $0x340] sm:$0xff]   ;;  %v5079_v18 = vld [vmem:[%s6548_s4 + $0x4f8] sm:$0xff]  }
 0x16a   :  { %4646 = vmatpush3.bf16.msra.mxu1 %v5036_v21  ;;  %v5072_v23 = vld [vmem:[%s6548_s4 + $0x388] sm:$0xff]   ;;  %v5076_v27 = vld [vmem:[%s6548_s4 + $0x380] sm:$0xff]   ;;  %v5081_v20 = vld [vmem:[%s6548_s4 + $0x478] sm:$0xff]   ;;  %v2651_v21 = vrot.slane %v5928_v38, 4 }
 0x16b   :  { %4647 = vmatprep.subr.bf16.mxu1 %v5039_v58  ;;  %v5074_v37 = vld [vmem:[%s6548_s4 + $0x308] sm:$0xff]   ;;  %v5078_v28 = vld [vmem:[%s6548_s4 + $0x300] sm:$0xff]   ;;  %v5080_v19 = vld [vmem:[%s6548_s4 + $0x4b8] sm:$0xff]  }
 0x16c   :  { %4624 = vmatpush3.bf16.msra.mxu0 %v5038_v25  ;;  %v5083_v29 = vld [vmem:[%s6548_s4 + $0x4f0] sm:$0xff]   ;;  %v5082_v57 = vld [vmem:[%s6548_s4 + $0x438] sm:$0xff]   ;;  %v5087_v39 = vld [vmem:[%s6548_s4 + $0x4e8] sm:$0xff]  }
 0x16d   :  { %4625 = vmatprep.subr.bf16.mxu0 %v5041_v12  ;;  %v5085_v46 = vld [vmem:[%s6548_s4 + $0x470] sm:$0xff]   ;;  %v5089_v58 = vld [vmem:[%s6548_s4 + $0x468] sm:$0xff]   ;;  %v5091_v3 = vld [vmem:[%s6548_s4 + $0x4e0] sm:$0xff]  }
 0x16e   :  { %4648 = vmatpush3.bf16.msra.mxu1 %v5040_v50  ;;  %v5084_v24 = vld [vmem:[%s6548_s4 + $0x4b0] sm:$0xff]   ;;  %v5093_v34 = vld [vmem:[%s6548_s4 + $0x460] sm:$0xff]   ;;  %v5095_v12 = vld [vmem:[%s6548_s4 + $0x4d8] sm:$0xff]  }
 0x16f   :  { %4649 = vmatprep.subr.bf16.mxu1 %v5043_v22  ;;  %v5086_v25 = vld [vmem:[%s6548_s4 + $0x430] sm:$0xff]   ;;  %v5092_v50 = vld [vmem:[%s6548_s4 + $0x4a0] sm:$0xff]   ;;  %v5097_v22 = vld [vmem:[%s6548_s4 + $0x458] sm:$0xff]  }
 0x170   :  { %4626 = vmatpush3.bf16.msra.mxu0 %v5042_v36  ;;  %v5094_v36 = vld [vmem:[%s6548_s4 + $0x420] sm:$0xff]  }
 0x171   :  { %4627 = vmatprep.subr.bf16.mxu0 %v5045_v47  ;;  %v5099_v47 = vld [vmem:[%s6548_s4 + $0x4d0] sm:$0xff]  }
 0x172   :  { %4650 = vmatpush3.bf16.msra.mxu1 %v5044_v45  ;;  %v5096_v45 = vld [vmem:[%s6548_s4 + $0x498] sm:$0xff]  }
 0x173   :  { %4679 = vmatprep.subr.bf16.mxu1 %v5047_v52  ;;  %v5101_v52 = vld [vmem:[%s6548_s4 + $0x450] sm:$0xff]  }
 0x174   :  { %4628 = vmatpush3.bf16.msra.mxu0 %v5046_v48  ;;  %v5098_v48 = vld [vmem:[%s6548_s4 + $0x418] sm:$0xff]  }
 0x175   :  { %2091 = vmatmul.mubr.bf16.vlgmr.msra.gmra.mxu1 %v1958_v53  ;;  %4657 = vmatprep.subr.bf16.mxu0 %v5049_v42  ;;  %v5103_v42 = vld [vmem:[%s6548_s4 + $0x4c8] sm:$0xff]  }
 0x176   :  { %4680 = vmatpush3.bf16.msra.mxu1 %v5048_v55  ;;  %2436 = vmatprep.mubr.bf16.mxu1 %v2305_v56  ;;  %v5100_v55 = vld [vmem:[%s6548_s4 + $0x490] sm:$0xff]   ;;  %v5105_v53 = vld [vmem:[%s6548_s4 + $0x448] sm:$0xff]  }
 0x177   :  { %1915 = vmatmul.mubr.bf16.vlgmr.msra.gmra.mxu0 %v5832_v13  ;;  %4681 = vmatprep.subr.bf16.mxu1 %v5051_v60  ;;  %v5056_v13 = vld [vmem:[%s6548_s4 + $0x3a8] sm:$0xff]   ;;  %v5102_v60 = vld [vmem:[%s6548_s4 + $0x410] sm:$0xff]  }
 0x178   :  { %4658 = vmatpush3.bf16.msra.mxu0 %v5050_v59  ;;  %2260 = vmatprep.mubr.bf16.mxu0 %v5887_v41  ;;  %v5058_v41 = vld [vmem:[%s6548_s4 + $0x328] sm:$0xff]   ;;  %v5107_v59 = vld [vmem:[%s6548_s4 + $0x4c0] sm:$0xff]  }
 0x179   :  { %4659 = vmatprep.subr.bf16.mxu0 %v5053_v61  ;;  %v5104_v56 = vld [vmem:[%s6548_s4 + $0x488] sm:$0xff]  }
 0x17a   :  { %4682 = vmatpush3.bf16.msra.mxu1 %v5052_v51  ;;  %v5106_v61 = vld [vmem:[%s6548_s4 + $0x408] sm:$0xff]   ;;  %v5109_v51 = vld [vmem:[%s6548_s4 + $0x440] sm:$0xff]  }
 0x17b   :  { %4683 = vmatprep.subr.bf16.mxu1 %v5055_v2  ;;  %v5108_v2 = vld [vmem:[%s6548_s4 + $0x480] sm:$0xff]  }
 0x17c   :  { %4660 = vmatpush3.bf16.msra.mxu0 %v5054_v6  ;;  %v5111_v6 = vld [vmem:[%s6548_s4 + $0x5f8] sm:$0xff]  }
 0x17d   :  { %4661 = vmatprep.subr.bf16.mxu0 %v5057_v1  ;;  %v5110_v1 = vld [vmem:[%s6548_s4 + $0x400] sm:$0xff]  }
 0x17e   :  { %4684 = vmatpush3.bf16.msra.mxu1 %v5056_v13  ;;  %v5113_v13 = vld [vmem:[%s6548_s4 + $0x578] sm:$0xff]  }
 0x17f   :  { %4685 = vmatprep.subr.bf16.mxu1 %v5059_v0  ;;  %v5112_v0 = vld [vmem:[%s6548_s4 + $0x5b8] sm:$0xff]  }
 0x180   :  { %4662 = vmatpush3.bf16.msra.mxu0 %v5058_v41  ;;  %v2650_v41 = vrot.slane %v5915_v16, 4 }
 0x181   :  { %4663 = vmatprep.subr.bf16.mxu0 %v5061_v43  ;;  %v5115_v43 = vld [vmem:[%s6548_s4 + $0x5f0] sm:$0xff]  }
 0x182   :  { %4686 = vmatpush3.bf16.msra.mxu1 %v5060_v4  ;;  %v2997_v4 = vrot.slane %v5971_v35, 4 }
 0x183   :  { %4687 = vmatprep.subr.bf16.mxu1 %v5063_v8  ;;  %v5114_v8 = vld [vmem:[%s6548_s4 + $0x538] sm:$0xff]  }
 0x184   :  { %4664 = vmatpush3.bf16.msra.mxu0 %v5062_v10  ;;  %v5117_v10 = vld [vmem:[%s6548_s4 + $0x570] sm:$0xff]  }
 0x185   :  { %4665 = vmatprep.subr.bf16.mxu0 %v5065_v44  ;;  %v5116_v44 = vld [vmem:[%s6548_s4 + $0x5b0] sm:$0xff]  }
 0x186   :  { %4688 = vmatpush3.bf16.msra.mxu1 %v5064_v33  ;;  %v5119_v33 = vld [vmem:[%s6548_s4 + $0x5e8] sm:$0xff]  }
 0x187   :  { %4689 = vmatprep.subr.bf16.mxu1 %v5067_v17  ;;  %v5118_v17 = vld [vmem:[%s6548_s4 + $0x530] sm:$0xff]  }
 0x188   :  { %4666 = vmatpush3.bf16.msra.mxu0 %v5066_v49  ;;  %v5121_v49 = vld [vmem:[%s6548_s4 + $0x568] sm:$0xff]  }
 0x189   :  { %4667 = vmatprep.subr.bf16.mxu0 %v5069_v54  ;;  %v5123_v54 = vld [vmem:[%s6548_s4 + $0x5e0] sm:$0xff]  }
 0x18a   :  { %4690 = vmatpush3.bf16.msra.mxu1 %v5068_v7  ;;  %v5125_v7 = vld [vmem:[%s6548_s4 + $0x560] sm:$0xff]  }
 0x18b   :  { %4691 = vmatprep.subr.bf16.mxu1 %v5071_v11  ;;  %v5124_v11 = vld [vmem:[%s6548_s4 + $0x5a0] sm:$0xff]  }
 0x18c   :  { %4668 = vmatpush3.bf16.msra.mxu0 %v5070_v26  ;;  %v5127_v26 = vld [vmem:[%s6548_s4 + $0x5d8] sm:$0xff]  }
 0x18d   :  { %4669 = vmatprep.subr.bf16.mxu0 %v5073_v32  ;;  %v5126_v32 = vld [vmem:[%s6548_s4 + $0x520] sm:$0xff]  }
 0x18e   :  { %4692 = vmatpush3.bf16.msra.mxu1 %v5072_v23  ;;  %v5129_v23 = vld [vmem:[%s6548_s4 + $0x558] sm:$0xff]  }
 0x18f   :  { %4693 = vmatprep.subr.bf16.mxu1 %v5075_v62  ;;  %v5128_v62 = vld [vmem:[%s6548_s4 + $0x598] sm:$0xff]  }
 0x190   :  { %4670 = vmatpush3.bf16.msra.mxu0 %v5074_v37  ;;  %v5131_v37 = vld [vmem:[%s6548_s4 + $0x5d0] sm:$0xff]  }
 0x191   :  { %4671 = vmatprep.subr.bf16.mxu0 %v5077_v31  ;;  %v5130_v31 = vld [vmem:[%s6548_s4 + $0x518] sm:$0xff]  }
 0x192   :  { %4694 = vmatpush3.bf16.msra.mxu1 %v5076_v27  ;;  %v5133_v27 = vld [vmem:[%s6548_s4 + $0x550] sm:$0xff]  }
 0x193   :  { %4723 = vmatprep.subr.bf16.mxu1 %v5079_v18  ;;  %v5132_v18 = vld [vmem:[%s6548_s4 + $0x590] sm:$0xff]  }
 0x194   :  { %4672 = vmatpush3.bf16.msra.mxu0 %v5078_v28  ;;  %v5135_v28 = vld [vmem:[%s6548_s4 + $0x5c8] sm:$0xff]  }
 0x195   :  { %2437 = vmatmul.mubr.bf16.vlgmr.msra.gmra.mxu1 %v2304_v14  ;;  %4701 = vmatprep.subr.bf16.mxu0 %v5081_v20  ;;  %v5134_v20 = vld [vmem:[%s6548_s4 + $0x510] sm:$0xff]   ;;  %v5136_v14 = vld [vmem:[%s6548_s4 + $0x588] sm:$0xff]  }
 0x196   :  { %4724 = vmatpush3.bf16.msra.mxu1 %v5080_v19  ;;  %2782 = vmatprep.mubr.bf16.mxu1 %v2651_v21  ;;  %v5137_v19 = vld [vmem:[%s6548_s4 + $0x548] sm:$0xff]  }
 0x197   :  { %2261 = vmatmul.mubr.bf16.vlgmr.msra.gmra.mxu0 %v5872_v63  ;;  %4725 = vmatprep.subr.bf16.mxu1 %v5083_v29  ;;  %v5088_v63 = vld [vmem:[%s6548_s4 + $0x4a8] sm:$0xff]   ;;  %v5139_v29 = vld [vmem:[%s6548_s4 + $0x5c0] sm:$0xff]  }
 0x198   :  { %4702 = vmatpush3.bf16.msra.mxu0 %v5082_v57  ;;  %2606 = vmatprep.mubr.bf16.mxu0 %v5928_v38  ;;  %v5090_v38 = vld [vmem:[%s6548_s4 + $0x428] sm:$0xff]   ;;  %v5141_v57 = vld [vmem:[%s6548_s4 + $0x540] sm:$0xff]  }
 0x199   :  { %4703 = vmatprep.subr.bf16.mxu0 %v5085_v46  ;;  %v5138_v21 = vld [vmem:[%s6548_s4 + $0x508] sm:$0xff]   ;;  %v5140_v46 = vld [vmem:[%s6548_s4 + $0x580] sm:$0xff]  }
 0x19a   :  { %4726 = vmatpush3.bf16.msra.mxu1 %v5084_v24  ;;  %v5143_v24 = vld [vmem:[%s6548_s4 + $0x6f8] sm:$0xff]  }
 0x19b   :  { %4727 = vmatprep.subr.bf16.mxu1 %v5087_v39  ;;  %v5142_v39 = vld [vmem:[%s6548_s4 + $0x500] sm:$0xff]  }
 0x19c   :  { %4704 = vmatpush3.bf16.msra.mxu0 %v5086_v25  ;;  %v5145_v25 = vld [vmem:[%s6548_s4 + $0x678] sm:$0xff]  }
 0x19d   :  { %4705 = vmatprep.subr.bf16.mxu0 %v5089_v58  ;;  %v5144_v58 = vld [vmem:[%s6548_s4 + $0x6b8] sm:$0xff]  }
 0x19e   :  { %4728 = vmatpush3.bf16.msra.mxu1 %v5088_v63  ;;  %v2996_v63 = vrot.slane %v5955_v40, 4 }
 0x19f   :  { %4729 = vmatprep.subr.bf16.mxu1 %v5091_v3  ;;  %v5147_v3 = vld [vmem:[%s6548_s4 + $0x6f0] sm:$0xff]  }
 0x1a0   :  { %4706 = vmatpush3.bf16.msra.mxu0 %v5090_v38  ;;  %v3343_v38 = vrot.slane %v6011_v30, 4 }
 0x1a1   :  { %4707 = vmatprep.subr.bf16.mxu0 %v5093_v34  ;;  %v5146_v34 = vld [vmem:[%s6548_s4 + $0x638] sm:$0xff]  }
 0x1a2   :  { %4730 = vmatpush3.bf16.msra.mxu1 %v5092_v50  ;;  %v5149_v50 = vld [vmem:[%s6548_s4 + $0x670] sm:$0xff]  }
 0x1a3   :  { %4731 = vmatprep.subr.bf16.mxu1 %v5095_v12  ;;  %v5148_v12 = vld [vmem:[%s6548_s4 + $0x6b0] sm:$0xff]  }
 0x1a4   :  { %4708 = vmatpush3.bf16.msra.mxu0 %v5094_v36  ;;  %v5151_v36 = vld [vmem:[%s6548_s4 + $0x6e8] sm:$0xff]  }
 0x1a5   :  { %4709 = vmatprep.subr.bf16.mxu0 %v5097_v22  ;;  %v5150_v22 = vld [vmem:[%s6548_s4 + $0x630] sm:$0xff]  }
 0x1a6   :  { %4732 = vmatpush3.bf16.msra.mxu1 %v5096_v45  ;;  %v5153_v45 = vld [vmem:[%s6548_s4 + $0x668] sm:$0xff]  }
 0x1a7   :  { %4733 = vmatprep.subr.bf16.mxu1 %v5099_v47  ;;  %v5155_v47 = vld [vmem:[%s6548_s4 + $0x6e0] sm:$0xff]  }
 0x1a8   :  { %4710 = vmatpush3.bf16.msra.mxu0 %v5098_v48  ;;  %v5157_v48 = vld [vmem:[%s6548_s4 + $0x660] sm:$0xff]  }
 0x1a9   :  { %4711 = vmatprep.subr.bf16.mxu0 %v5101_v52  ;;  %v5156_v52 = vld [vmem:[%s6548_s4 + $0x6a0] sm:$0xff]  }
 0x1aa   :  { %4734 = vmatpush3.bf16.msra.mxu1 %v5100_v55  ;;  %v5159_v55 = vld [vmem:[%s6548_s4 + $0x6d8] sm:$0xff]  }
 0x1ab   :  { %4735 = vmatprep.subr.bf16.mxu1 %v5103_v42  ;;  %v5158_v42 = vld [vmem:[%s6548_s4 + $0x620] sm:$0xff]  }
 0x1ac   :  { %4712 = vmatpush3.bf16.msra.mxu0 %v5102_v60  ;;  %v5161_v60 = vld [vmem:[%s6548_s4 + $0x658] sm:$0xff]  }
 0x1ad   :  { %4713 = vmatprep.subr.bf16.mxu0 %v5105_v53  ;;  %v5160_v53 = vld [vmem:[%s6548_s4 + $0x698] sm:$0xff]  }
 0x1ae   :  { %4736 = vmatpush3.bf16.msra.mxu1 %v5104_v56  ;;  %v5163_v56 = vld [vmem:[%s6548_s4 + $0x6d0] sm:$0xff]  }
 0x1af   :  { %4737 = vmatprep.subr.bf16.mxu1 %v5107_v59  ;;  %v5162_v59 = vld [vmem:[%s6548_s4 + $0x618] sm:$0xff]  }
 0x1b0   :  { %4714 = vmatpush3.bf16.msra.mxu0 %v5106_v61  ;;  %v5165_v61 = vld [vmem:[%s6548_s4 + $0x650] sm:$0xff]  }
 0x1b1   :  { %4715 = vmatprep.subr.bf16.mxu0 %v5109_v51  ;;  %v5164_v51 = vld [vmem:[%s6548_s4 + $0x690] sm:$0xff]  }
 0x1b2   :  { %4738 = vmatpush3.bf16.msra.mxu1 %v5108_v2  ;;  %v5167_v2 = vld [vmem:[%s6548_s4 + $0x6c8] sm:$0xff]  }
 0x1b3   :  { %4767 = vmatprep.subr.bf16.mxu1 %v5111_v6  ;;  %v5166_v6 = vld [vmem:[%s6548_s4 + $0x610] sm:$0xff]  }
 0x1b4   :  { %4716 = vmatpush3.bf16.msra.mxu0 %v5110_v1  ;;  %v5169_v1 = vld [vmem:[%s6548_s4 + $0x648] sm:$0xff]  }
 0x1b5   :  { %2783 = vmatmul.mubr.bf16.vlgmr.msra.gmra.mxu1 %v2650_v41  ;;  %4745 = vmatprep.subr.bf16.mxu0 %v5113_v13  ;;  %v5168_v13 = vld [vmem:[%s6548_s4 + $0x688] sm:$0xff]  }
 0x1b6   :  { %4768 = vmatpush3.bf16.msra.mxu1 %v5112_v0  ;;  %3128 = vmatprep.mubr.bf16.mxu1 %v2997_v4  ;;  %v5171_v0 = vld [vmem:[%s6548_s4 + $0x6c0] sm:$0xff]   ;;  %v5170_v41 = vld [vmem:[%s6548_s4 + $0x608] sm:$0xff]  }
 0x1b7   :  { %2607 = vmatmul.mubr.bf16.vlgmr.msra.gmra.mxu0 %v5915_v16  ;;  %4769 = vmatprep.subr.bf16.mxu1 %v5115_v43  ;;  %v5120_v16 = vld [vmem:[%s6548_s4 + $0x5a8] sm:$0xff]   ;;  %v5173_v43 = vld [vmem:[%s6548_s4 + $0x640] sm:$0xff]  }
 0x1b8   :  { %4746 = vmatpush3.bf16.msra.mxu0 %v5114_v8  ;;  %2952 = vmatprep.mubr.bf16.mxu0 %v5971_v35  ;;  %v5122_v35 = vld [vmem:[%s6548_s4 + $0x528] sm:$0xff]   ;;  %v5172_v4 = vld [vmem:[%s6548_s4 + $0x680] sm:$0xff]  }
 0x1b9   :  { %4747 = vmatprep.subr.bf16.mxu0 %v5117_v10  ;;  %v5174_v8 = vld [vmem:[%s6548_s4 + $0x600] sm:$0xff]   ;;  %v5175_v10 = vld [vmem:[%s6548_s4 + $0x778] sm:$0xff]  }
 0x1ba   :  { %4770 = vmatpush3.bf16.msra.mxu1 %v5116_v44  ;;  %v3342_v44 = vrot.slane %v5996_v15, 4 }
 0x1bb   :  { %4771 = vmatprep.subr.bf16.mxu1 %v5119_v33  ;;  %v5176_v33 = vld [vmem:[%s6548_s4 + $0x738] sm:$0xff]  }
 0x1bc   :  { %4748 = vmatpush3.bf16.msra.mxu0 %v5118_v17 }
 0x1bd   :  { %4749 = vmatprep.subr.bf16.mxu0 %v5121_v49  ;;  %v5177_v49 = vld [vmem:[%s6548_s4 + $0x770] sm:$0xff]  }
 0x1be   :  { %4772 = vmatpush3.bf16.msra.mxu1 %v5120_v16 }
 0x1bf   :  { %4773 = vmatprep.subr.bf16.mxu1 %v5123_v54 }
 0x1c0   :  { %4750 = vmatpush3.bf16.msra.mxu0 %v5122_v35 }
 0x1c1   :  { %4751 = vmatprep.subr.bf16.mxu0 %v5125_v7  ;;  %v5178_v7 = vld [vmem:[%s6548_s4 + $0x730] sm:$0xff]  }
 0x1c2   :  { %4774 = vmatpush3.bf16.msra.mxu1 %v5124_v11 }
 0x1c3   :  { %4775 = vmatprep.subr.bf16.mxu1 %v5127_v26 }
 0x1c4   :  { %4752 = vmatpush3.bf16.msra.mxu0 %v5126_v32  ;;  %v5179_v32 = vld [vmem:[%s6548_s4 + $0x768] sm:$0xff]  }
 0x1c5   :  { %4753 = vmatprep.subr.bf16.mxu0 %v5129_v23 }
 0x1c6   :  { %4776 = vmatpush3.bf16.msra.mxu1 %v5128_v62 }
 0x1c7   :  { %4777 = vmatprep.subr.bf16.mxu1 %v5131_v37 }
 0x1c8   :  { %4754 = vmatpush3.bf16.msra.mxu0 %v5130_v31 }
 0x1c9   :  { %4755 = vmatprep.subr.bf16.mxu0 %v5133_v27  ;;  %v5181_v27 = vld [vmem:[%s6548_s4 + $0x760] sm:$0xff]  }
 0x1ca   :  { %4778 = vmatpush3.bf16.msra.mxu1 %v5132_v18  ;;  %v5182_v18 = vld [vmem:[%s6548_s4 + $0x720] sm:$0xff]  }
 0x1cb   :  { %4779 = vmatprep.subr.bf16.mxu1 %v5135_v28  ;;  %v5183_v28 = vld [vmem:[%s6548_s4 + $0x758] sm:$0xff]  }
 0x1cc   :  { %4756 = vmatpush3.bf16.msra.mxu0 %v5134_v20  ;;  %v5184_v20 = vld [vmem:[%s6548_s4 + $0x718] sm:$0xff]  }
 0x1cd   :  { %4757 = vmatprep.subr.bf16.mxu0 %v5137_v19  ;;  %v5185_v19 = vld [vmem:[%s6548_s4 + $0x750] sm:$0xff]  }
 0x1ce   :  { %4780 = vmatpush3.bf16.msra.mxu1 %v5136_v14  ;;  %v5186_v14 = vld [vmem:[%s6548_s4 + $0x710] sm:$0xff]  }
 0x1cf   :  { %4781 = vmatprep.subr.bf16.mxu1 %v5139_v29  ;;  %v5187_v29 = vld [vmem:[%s6548_s4 + $0x748] sm:$0xff]  }
 0x1d0   :  { %4758 = vmatpush3.bf16.msra.mxu0 %v5138_v21  ;;  %v5188_v21 = vld [vmem:[%s6548_s4 + $0x708] sm:$0xff]  }
 0x1d1   :  { %4759 = vmatprep.subr.bf16.mxu0 %v5141_v57  ;;  %v5189_v57 = vld [vmem:[%s6548_s4 + $0x740] sm:$0xff]  }
 0x1d2   :  { %4782 = vmatpush3.bf16.msra.mxu1 %v5140_v46  ;;  %v5190_v46 = vld [vmem:[%s6548_s4 + $0x700] sm:$0xff]  }
 0x1d3   :  { %4811 = vmatprep.subr.bf16.mxu1 %v5143_v24 }
 0x1d4   :  { %4760 = vmatpush3.bf16.msra.mxu0 %v5142_v39 }
 0x1d5   :  { %3129 = vmatmul.mubr.bf16.vlgmr.msra.gmra.mxu1 %v2996_v63  ;;  %4789 = vmatprep.subr.bf16.mxu0 %v5145_v25 }
 0x1d6   :  { %4812 = vmatpush3.bf16.msra.mxu1 %v5144_v58  ;;  %3474 = vmatprep.mubr.bf16.mxu1 %v3343_v38 }
 0x1d7   :  { %2953 = vmatmul.mubr.bf16.vlgmr.msra.gmra.mxu0 %v5955_v40  ;;  %4813 = vmatprep.subr.bf16.mxu1 %v5147_v3  ;;  %v5152_v40 = vld [vmem:[%s6548_s4 + $0x6a8] sm:$0xff]  }
 0x1d8   :  { %4790 = vmatpush3.bf16.msra.mxu0 %v5146_v34  ;;  %3298 = vmatprep.mubr.bf16.mxu0 %v6011_v30  ;;  %v5154_v30 = vld [vmem:[%s6548_s4 + $0x628] sm:$0xff]  }
 0x1d9   :  { %4791 = vmatprep.subr.bf16.mxu0 %v5149_v50 }
 0x1da   :  { %4814 = vmatpush3.bf16.msra.mxu1 %v5148_v12 }
 0x1db   :  { %4815 = vmatprep.subr.bf16.mxu1 %v5151_v36 }
 0x1dc   :  { %4792 = vmatpush3.bf16.msra.mxu0 %v5150_v22 }
 0x1dd   :  { %4793 = vmatprep.subr.bf16.mxu0 %v5153_v45 }
 0x1de   :  { %4816 = vmatpush3.bf16.msra.mxu1 %v5152_v40 }
 0x1df   :  { %4817 = vmatprep.subr.bf16.mxu1 %v5155_v47 }
 0x1e0   :  { %4794 = vmatpush3.bf16.msra.mxu0 %v5154_v30 }
 0x1e1   :  { %4795 = vmatprep.subr.bf16.mxu0 %v5157_v48 }
 0x1e2   :  { %4818 = vmatpush3.bf16.msra.mxu1 %v5156_v52 }
 0x1e3   :  { %4819 = vmatprep.subr.bf16.mxu1 %v5159_v55 }
 0x1e4   :  { %4796 = vmatpush3.bf16.msra.mxu0 %v5158_v42 }
 0x1e5   :  { %4797 = vmatprep.subr.bf16.mxu0 %v5161_v60 }
 0x1e6   :  { %4820 = vmatpush3.bf16.msra.mxu1 %v5160_v53 }
 0x1e7   :  { %4821 = vmatprep.subr.bf16.mxu1 %v5163_v56 }
 0x1e8   :  { %4798 = vmatpush3.bf16.msra.mxu0 %v5162_v59  ;;  %v5200_v59 = vmov 0.0  }
 0x1e9   :  { %4799 = vmatprep.subr.bf16.mxu0 %v5165_v61  ;;  %v5191_v61 = vld [vmem:[%s6550_s6 + $0x38] sm:$0xff]  }
 0x1ea   :  { %4822 = vmatpush3.bf16.msra.mxu1 %v5164_v51  ;;  %v5192_v51 = vld [vmem:[%s6550_s6 + $0x30] sm:$0xff]  }
 0x1eb   :  { %4823 = vmatprep.subr.bf16.mxu1 %v5167_v2  ;;  %v5193_v2 = vld [vmem:[%s6550_s6 + $0x28] sm:$0xff]  }
 0x1ec   :  { %4800 = vmatpush3.bf16.msra.mxu0 %v5166_v6  ;;  %v5194_v6 = vld [vmem:[%s6550_s6 + $0x20] sm:$0xff]  }
 0x1ed   :  { %4801 = vmatprep.subr.bf16.mxu0 %v5169_v1  ;;  %v5195_v1 = vld [vmem:[%s6550_s6 + $0x18] sm:$0xff]  }
 0x1ee   :  { %4824 = vmatpush3.bf16.msra.mxu1 %v5168_v13 }
 0x1ef   :  { %4825 = vmatprep.subr.bf16.mxu1 %v5171_v0 }
 0x1f0   :  { %4802 = vmatpush3.bf16.msra.mxu0 %v5170_v41 }
 0x1f1   :  { %4803 = vmatprep.subr.bf16.mxu0 %v5173_v43 }
 0x1f2   :  { %4826 = vmatpush3.bf16.msra.mxu1 %v5172_v4  ;;  %v5196_v4 = vld [vmem:[%s6550_s6 + $0x10] sm:$0xff]  }
 0x1f3   :  { %4864 = vmatprep.subr.bf16.mxu1 %v5200_v59 }
 0x1f4   :  { %4804 = vmatpush3.bf16.msra.mxu0 %v5174_v8 }
 0x1f5   :  { %3475 = vmatmul.mubr.bf16.vlgmr.msra.gmra.mxu1 %v3342_v44  ;;  %v4563_v17 = vpop.f32.mrf.mxu1  ;;  %4833 = vmatprep.subr.bf16.mxu0 %v5175_v10 }
 0x1f6   :  { %4865 = vmatpush3.bf16.msra.mxu1 %v5191_v61  ;;  %4880 = vmatprep.mubr.msk.bf16.mxu1 %vm5201_vm0, %v5200_v59 }
 0x1f7   :  { %3299 = vmatmul.mubr.bf16.vlgmr.msra.gmra.mxu0 %v5996_v15  ;;  %v4541_v16 = vpop.f32.mrf.mxu0  ;;  %v4564_v54 = vpop.f32.mrf.mxu1  ;;  %4866 = vmatprep.subr.bf16.mxu1 %v5200_v59 }
 0x1f8   :  { %v4565_v35 = vadd.f32 %v4564_v54, %v4563_v17  ;;  %4834 = vmatpush3.bf16.msra.mxu0 %v5176_v33  ;;  %3644 = vmatprep.mubr.bf16.mxu0 %v6046_v5  ;;  %v5180_v5 = vld [vmem:[%s6548_s4 + $0x728] sm:$0xff]  }
 0x1f9   :  { %v4542_v11 = vpop.f32.mrf.mxu0  ;;  %v4566_v26 = vpop.f32.mrf.mxu1  ;;  %4835 = vmatprep.subr.bf16.mxu0 %v5177_v49 }
 0x1fa   :  { %v4543_v23 = vadd.f32 %v4542_v11, %v4541_v16  ;;  %4867 = vmatpush3.bf16.msra.mxu1 %v5192_v51  ;;  %v5197_v16 = vld [vmem:[%s6550_s6 + $0x8] sm:$0xff]  }
 0x1fb   :  { %v4544_v62 = vpop.f32.mrf.mxu0  ;;  %v4567_v15 = vpop.f32.mrf.mxu1  ;;  %4868 = vmatprep.subr.bf16.mxu1 %v5200_v59 }
 0x1fc   :  { %v1402_v37 = vadd.f32 %v4565_v35, %v4543_v23  ;;  %4836 = vmatpush3.bf16.msra.mxu0 %v5178_v7  ;;  %v5198_v7 = vld [vmem:[%s6550_s6] sm:$0xff]  }
 0x1fd   :  { %v4545_v31 = vpop.f32.mrf.mxu0  ;;  %4837 = vmatprep.subr.bf16.mxu0 %v5179_v32 }
 0x1fe   :  { %4869 = vmatpush3.bf16.msra.mxu1 %v5193_v2  ;;  %v4516_v2 = vld [vmem:[%s6552_s7] ss:$0 sm:$0xff] }
 0x1ff   :  { %4870 = vmatprep.subr.bf16.mxu1 %v5200_v59 }
 0x200   :  { %4838 = vmatpush3.bf16.msra.mxu0 %v5180_v5 }
 0x201   :  { %4839 = vmatprep.subr.bf16.mxu0 %v5181_v27 }
 0x202   :  { %4871 = vmatpush3.bf16.msra.mxu1 %v5194_v6 }
 0x203   :  { %4872 = vmatprep.subr.bf16.mxu1 %v5200_v59 }
 0x204   :  { %4840 = vmatpush3.bf16.msra.mxu0 %v5182_v18 }
 0x205   :  { %4841 = vmatprep.subr.bf16.mxu0 %v5183_v28 }
 0x206   :  { %4873 = vmatpush3.bf16.msra.mxu1 %v5195_v1 }
 0x207   :  { %4874 = vmatprep.subr.bf16.mxu1 %v5200_v59 }
 0x208   :  { %4842 = vmatpush3.bf16.msra.mxu0 %v5184_v20 }
 0x209   :  { %4843 = vmatprep.subr.bf16.mxu0 %v5185_v19 }
 0x20a   :  { %4875 = vmatpush3.bf16.msra.mxu1 %v5196_v4 }
 0x20b   :  { %4876 = vmatprep.subr.bf16.mxu1 %v5200_v59 }
 0x20c   :  { %4844 = vmatpush3.bf16.msra.mxu0 %v5186_v14 }
 0x20d   :  { %4845 = vmatprep.subr.bf16.mxu0 %v5187_v29 }
 0x20e   :  { %4877 = vmatpush3.bf16.msra.mxu1 %v5197_v16 }
 0x20f   :  { %4878 = vmatprep.subr.bf16.mxu1 %v5200_v59 }
 0x210   :  { %4846 = vmatpush3.bf16.msra.mxu0 %v5188_v21 }
 0x211   :  { %4847 = vmatprep.subr.bf16.mxu0 %v5189_v57 }
 0x212   :  { %4879 = vmatpush3.bf16.msra.mxu1 %v5198_v7 }
 0x214   :  { %4848 = vmatpush3.bf16.msra.mxu0 %v5190_v46 }
 0x215   :  { %v4607_v24 = vpop.f32.mrf.mxu1 }
 0x217   :  { %v4585_v39 = vpop.f32.mrf.mxu0  ;;  %v4608_v25 = vpop.f32.mrf.mxu1  ;;  %3645 = vmatmul.mubr.bf16.vlgmr.msra.gmra.mxu0 %v6034_v9 }
 0x218   :  { %v4609_v58 = vadd.f32 %v4608_v25, %v4607_v24 }
 0x219   :  { %v4586_v63 = vpop.f32.mrf.mxu0  ;;  %v4610_v3 = vpop.f32.mrf.mxu1 }
 0x21a   :  { %v4587_v38 = vadd.f32 %v4586_v63, %v4585_v39 }
 0x21b   :  { %v4588_v34 = vpop.f32.mrf.mxu0  ;;  %v4611_v50 = vpop.f32.mrf.mxu1 }
 0x21c   :  { %v1576_v12 = vadd.f32 %v4587_v38, %v1402_v37 }
 0x21d   :  { %v4589_v36 = vpop.f32.mrf.mxu0 }
 0x21e   :  { %v1752_v22 = vadd.f32 %v4609_v58, %v1576_v12 }
 0x235   :  { %v4651_v45 = vpop.f32.mrf.mxu1 }
 0x237   :  { %v4629_v40 = vpop.f32.mrf.mxu0  ;;  %v4652_v47 = vpop.f32.mrf.mxu1 }
 0x238   :  { %v4653_v30 = vadd.f32 %v4652_v47, %v4651_v45 }
 0x239   :  { %v4630_v48 = vpop.f32.mrf.mxu0  ;;  %v4654_v52 = vpop.f32.mrf.mxu1 }
 0x23a   :  { %v4631_v55 = vadd.f32 %v4630_v48, %v4629_v40 }
 0x23b   :  { %v4632_v42 = vpop.f32.mrf.mxu0  ;;  %v4655_v60 = vpop.f32.mrf.mxu1 }
 0x23c   :  { %v1922_v53 = vadd.f32 %v4631_v55, %v1752_v22  ;;  %v4515_v60 = vld [vmem:[%s6551_s5] ss:$0 sm:$0xff] }
 0x23d   :  { %v4633_v9 = vpop.f32.mrf.mxu0 }
 0x23e   :  { %v2098_v56 = vadd.f32 %v4653_v30, %v1922_v53 }
 0x255   :  { %v4695_v13 = vpop.f32.mrf.mxu1 }
 0x257   :  { %v4673_v0 = vpop.f32.mrf.mxu0  ;;  %v4696_v41 = vpop.f32.mrf.mxu1 }
 0x258   :  { %v4697_v43 = vadd.f32 %v4696_v41, %v4695_v13 }
 0x259   :  { %v4674_v8 = vpop.f32.mrf.mxu0  ;;  %v4698_v10 = vpop.f32.mrf.mxu1 }
 0x25a   :  { %v4675_v44 = vadd.f32 %v4674_v8, %v4673_v0 }
 0x25b   :  { %v4676_v33 = vpop.f32.mrf.mxu0  ;;  %v4699_v17 = vpop.f32.mrf.mxu1 }
 0x25c   :  { %v2268_v49 = vadd.f32 %v4675_v44, %v2098_v56 }
 0x25d   :  { %v4677_v54 = vpop.f32.mrf.mxu0 }
 0x25e   :  { %v2444_v35 = vadd.f32 %v4697_v43, %v2268_v49 }
 0x275   :  { %v4739_v11 = vpop.f32.mrf.mxu1 }
 0x277   :  { %v4717_v26 = vpop.f32.mrf.mxu0  ;;  %v4740_v32 = vpop.f32.mrf.mxu1 }
 0x278   :  { %v4741_v23 = vadd.f32 %v4740_v32, %v4739_v11 }
 0x279   :  { %v4718_v62 = vpop.f32.mrf.mxu0  ;;  %v4742_v15 = vpop.f32.mrf.mxu1 }
 0x27a   :  { %v4719_v37 = vadd.f32 %v4718_v62, %v4717_v26 }
 0x27b   :  { %v4720_v5 = vpop.f32.mrf.mxu0  ;;  %v4743_v31 = vpop.f32.mrf.mxu1 }
 0x27c   :  { %v2614_v27 = vadd.f32 %v4719_v37, %v2444_v35 }
 0x27d   :  { %v4721_v18 = vpop.f32.mrf.mxu0 }
 0x27e   :  { %v2790_v28 = vadd.f32 %v4741_v23, %v2614_v27 }
 0x295   :  { %v4783_v20 = vpop.f32.mrf.mxu1 }
 0x297   :  { %v4761_v19 = vpop.f32.mrf.mxu0  ;;  %v4784_v14 = vpop.f32.mrf.mxu1 }
 0x298   :  { %v4785_v22 = vadd.f32 %v4784_v14, %v4783_v20 }
 0x299   :  { %v4762_v29 = vpop.f32.mrf.mxu0  ;;  %v4786_v21 = vpop.f32.mrf.mxu1 }
 0x29a   :  { %v4763_v12 = vadd.f32 %v4762_v29, %v4761_v19 }
 0x29b   :  { %v4764_v57 = vpop.f32.mrf.mxu0  ;;  %v4787_v46 = vpop.f32.mrf.mxu1 }
 0x29c   :  { %v2960_v36 = vadd.f32 %v4763_v12, %v2790_v28 }
 0x29d   :  { %v4765_v24 = vpop.f32.mrf.mxu0 }
 0x29e   :  { %v3136_v40 = vadd.f32 %v4785_v22, %v2960_v36 }
 0x2b5   :  { %v4827_v39 = vpop.f32.mrf.mxu1 }
 0x2b7   :  { %v4805_v25 = vpop.f32.mrf.mxu0  ;;  %v4828_v58 = vpop.f32.mrf.mxu1 }
 0x2b8   :  { %v4829_v48 = vadd.f32 %v4828_v58, %v4827_v39 }
 0x2b9   :  { %v4806_v63 = vpop.f32.mrf.mxu0  ;;  %v4830_v3 = vpop.f32.mrf.mxu1 }
 0x2ba   :  { %v4807_v45 = vadd.f32 %v4806_v63, %v4805_v25 }
 0x2bb   :  { %v4808_v38 = vpop.f32.mrf.mxu0  ;;  %v4831_v34 = vpop.f32.mrf.mxu1 }
 0x2bc   :  { %v3306_v47 = vadd.f32 %v4807_v45, %v3136_v40 }
 0x2bd   :  { %v4809_v50 = vpop.f32.mrf.mxu0 }
 0x2be   :  { %v3482_v55 = vadd.f32 %v4829_v48, %v3306_v47 }
 0x2d7   :  { %v4849_v30 = vpop.f32.mrf.mxu0 }
 0x2d9   :  { %v4850_v52 = vpop.f32.mrf.mxu0 }
 0x2da   :  { %v4851_v42 = vadd.f32 %v4850_v52, %v4849_v30 }
 0x2db   :  { %v4852_v53 = vpop.f32.mrf.mxu0 }
 0x2dc   :  { %v3652_v9 = vadd.f32 %v4851_v42, %v3482_v55 }
 0x2dd   :  { %v4853_v56 = vpop.f32.mrf.mxu0 }
 0x2de   :  { %v3660_v59 = vadd.f32 %v4515_v60, %v3652_v9 }
 0x2e0   :  { %v3661_v61 = vmax.f32 %v3660_v59, 0.0 }
 0x2e2   :  { %v3662_v51 = vpack.c.bf16 %v3661_v61, %v3661_v61 }
 0x2e4   :  { %4881 = vmatmul.mubr.bf16.vlgmr.msra.gmra.mxu1 %v3662_v51 }
 0x3a4   :  { %v3768_v6 = vpop.f32.mrf.mxu1 }
 0x3a5   :  { %v3769_v1 = vadd.f32 %v4516_v2, %v3768_v6 }
 0x3a6   :  { %v4882_v13 = vpop.f32.mrf.mxu1 }
 0x3a7   :  { %3774 = vst [vmem:[%s6553_s8] sm:$0xff] %v3769_v1 }
 0x3a8   :  { %v3771_v0 = vpop.f32.mrf.mxu1 }
 0x3aa   :  { %v4883_v41 = vpop.f32.mrf.mxu1 }

</bundles_post_ra>
